<compile_context>
chip_gen: v7x
topology: tpu7x:2x2x1
jax: 0.10.0
libtpu: 0.0.40
codegen_flags: <defaults>
</compile_context>

<pallas_src>
import functools

import jax
import jax.numpy as jnp
from jax.experimental import pallas as pl
from jax.experimental.pallas import tpu as pltpu

MAX_FEATURES = 1000
HIDDEN = 32


def _round_up(n, m):
    return ((n + m - 1) // m) * m


def _mlp_kernel(x_ref, w1_ref, b1_ref, w2_ref, b2_ref, o_ref, *, compute_dtype):
    # fc1 + ReLU.  x arrives in its native f32 HBM layout and is cast to the
    # compute dtype in VMEM (VPU work, hidden under the x DMA); the matmul
    # accumulates in f32 on the MXU.
    x = x_ref[...].astype(compute_dtype)
    h = jnp.dot(x, w1_ref[...], preferred_element_type=jnp.float32)
    h = jnp.maximum(h + b1_ref[...], 0.0)
    # TODO(synk): Dropout(p=0.2) is the eval-mode identity here; train-mode
    # parity would need pltpu.prng_seed + pltpu.prng_random_bits masking and a
    # 1/(1-p) rescale.
    # Output layer: (tile, 32) * (1, 32) broadcast-multiply + lane reduce on
    # the VPU/XLU (keeps the MXU free; this is filler in idle slots).
    z = jnp.sum(h * w2_ref[...], axis=-1, keepdims=True) + b2_ref[0, 0]
    o_ref[...] = jax.nn.sigmoid(z).astype(o_ref.dtype)


def mlp_forward(x, w1, b1, w2, b2, *, tile_b=2048, compute_dtype=jnp.bfloat16):
    """Forward pass: sigmoid(relu(x @ w1 + b1) @ w2 + b2).

    x:  (B, F) float32 — streamed from HBM as-is (no wrapper pad/cast pass).
    w1: (F, 32); b1: (32,) or (1, 32); w2: (32, 1) or (32,); b2: scalar-ish.
    compute_dtype: matmul operand dtype.  bf16 by default (inputs quantized to
    ~3e-3 relative); pass jnp.float32 for tighter agreement with a f32 model.
    """
    B, F = x.shape
    w1_c = jnp.asarray(w1).astype(compute_dtype)             # (F, 32)
    assert w1_c.shape == (F, HIDDEN)

    # Pad the batch only to a multiple of 8 sublanes (<= 7 rows), never to a
    # multiple of the tile — the last grid step is simply a partial block.
    B_pad = _round_up(B, 8)
    if B_pad != B:
        x = jnp.pad(x, ((0, B_pad - B), (0, 0)))

    # Large batch tiles amortize the ~0.35 us per-grid-step overhead.
    # Sweet spots: 1024-2048 (v6e), 2048-4096 (v7x), up to 4096-8192 (v5e).
    tile = max(8, min(_round_up(tile_b, 8), B_pad))
    grid = (pl.cdiv(B_pad, tile),)

    # Small operands (tiny, one-shot): f32 biases, row-layout w2 for the reduce.
    b1_r = jnp.asarray(b1, jnp.float32).reshape(1, HIDDEN)
    w2_r = jnp.asarray(w2, jnp.float32).reshape(1, HIDDEN)
    b2_r = jnp.asarray(b2, jnp.float32).reshape(1, 1)

    # VMEM budget: x double-buffer dominates.  Keep headroom for v7x (64 MiB
    # physical) while exceeding the small default scoped limit on v5e/v6e.
    x_block_bytes = tile * F * x.dtype.itemsize
    vmem_limit = int(min(96 * 2**20, max(32 * 2**20, 3 * x_block_bytes)))

    cdt_bytes = jnp.dtype(compute_dtype).itemsize
    cost = pl.CostEstimate(
        flops=2 * B_pad * F * HIDDEN + 2 * B_pad * HIDDEN,
        transcendentals=B_pad,
        bytes_accessed=(B_pad * F * x.dtype.itemsize
                        + F * HIDDEN * cdt_bytes
                        + B_pad * 4
                        + 2 * HIDDEN * 4 + 4),
    )

    out = pl.pallas_call(
        functools.partial(_mlp_kernel, compute_dtype=compute_dtype),
        out_shape=jax.ShapeDtypeStruct((B_pad, 1), jnp.float32),
        grid_spec=pltpu.PrefetchScalarGridSpec(
            num_scalar_prefetch=0,
            grid=grid,
            in_specs=[
                # x: streamed per batch tile, f32, full (un-padded) feature
                # axis — last block dim equals the full array dim, so it is
                # legal without 128-lane padding.
                pl.BlockSpec((tile, F), lambda i: (i, 0)),
                # Weights/biases: constant index maps -> fetched once and
                # resident in VMEM for the whole grid.
                pl.BlockSpec((F, HIDDEN), lambda i: (0, 0)),
                pl.BlockSpec((1, HIDDEN), lambda i: (0, 0)),
                pl.BlockSpec((1, HIDDEN), lambda i: (0, 0)),
                # b2: single scalar, keep it in SMEM.
                pl.BlockSpec(memory_space=pltpu.MemorySpace.SMEM),
            ],
            out_specs=pl.BlockSpec((tile, 1), lambda i: (i, 0)),
        ),
        compiler_params=pltpu.CompilerParams(
            # Independent batch tiles -> megacore sharding on multi-TC chips.
            dimension_semantics=("parallel",),
            vmem_limit_bytes=vmem_limit,
        ),
        cost_estimate=cost,
    )(x, w1_c, b1_r, w2_r, b2_r)

    return out[:B]


def init_params(key, max_features=MAX_FEATURES, hidden=HIDDEN):
    """Deterministic PyTorch-style init: U(-1/sqrt(fan_in), 1/sqrt(fan_in))."""
    k1, k2, k3, k4 = jax.random.split(key, 4)
    bound1 = 1.0 / jnp.sqrt(jnp.float32(max_features))
    bound2 = 1.0 / jnp.sqrt(jnp.float32(hidden))
    w1 = jax.random.uniform(k1, (max_features, hidden), jnp.float32,
                            -bound1, bound1)
    b1 = jax.random.uniform(k2, (1, hidden), jnp.float32, -bound1, bound1)
    w2 = jax.random.uniform(k3, (hidden, 1), jnp.float32, -bound2, bound2)
    b2 = jax.random.uniform(k4, (1, 1), jnp.float32, -bound2, bound2)
    return w1, b1, w2, b2


if __name__ == "__main__":
    key = jax.random.PRNGKey(0)
    kx, kp = jax.random.split(key)

    # Batch intentionally smaller than the default tile (single partial-free
    # grid step) but exercising the "no tile-multiple padding" path.
    B = 200
    x = jax.random.normal(kx, (B, MAX_FEATURES), jnp.float32)
    w1, b1, w2, b2 = init_params(kp)

    out = mlp_forward(x, w1, b1, w2, b2)
    out = jax.block_until_ready(out)

    # Plain-JAX f32 reference (bf16 compute dtype => loosened tolerance).
    ref = jax.nn.sigmoid(jnp.maximum(x @ w1 + b1, 0.0) @ w2 + b2)
    assert out.shape == (B, 1)
    max_err = float(jnp.max(jnp.abs(out - ref)))
    assert jnp.allclose(out, ref, atol=1e-2, rtol=1e-2), max_err

    print("KERNEL_OK")
</pallas_src>

<mosaic_0001>
module attributes {stable_mosaic.version = 11 : i64} {
  func.func @_mlp_kernel(%arg0: i32, %arg1: memref<200x1000xf32, #tpu.memory_space<vmem>>, %arg2: memref<1000x32xbf16, #tpu.memory_space<vmem>>, %arg3: memref<1x32xf32, #tpu.memory_space<vmem>>, %arg4: memref<1x32xf32, #tpu.memory_space<vmem>>, %arg5: memref<1x1xf32, #tpu.memory_space<smem>>, %arg6: memref<200x1xf32, #tpu.memory_space<vmem>>) attributes {dimension_semantics = [#tpu.dimension_semantics<parallel>], iteration_bounds = array<i64: 1>, scalar_prefetch = 0 : i64, scratch_operands = 0 : i64, tpu.core_type = #tpu.core_type<tc>, window_params = [{transform_indices = @transform_0, window_bounds = array<i64: 200, 1000>}, {pipeline_mode = #tpu.pipeline_mode<synchronous>, transform_indices = @transform_1, window_bounds = array<i64: 1000, 32>}, {pipeline_mode = #tpu.pipeline_mode<synchronous>, transform_indices = @transform_2, window_bounds = array<i64: 1, 32>}, {pipeline_mode = #tpu.pipeline_mode<synchronous>, transform_indices = @transform_3, window_bounds = array<i64: 1, 32>}, {transform_indices = @transform_4, window_bounds = array<i64: 1, 1>}, {transform_indices = @transform_5, window_bounds = array<i64: 200, 1>}]} {
    %c0 = arith.constant 0 : index
    %c0_0 = arith.constant 0 : index
    %0 = vector.load %arg1[%c0, %c0_0] : memref<200x1000xf32, #tpu.memory_space<vmem>>, vector<200x1000xf32>
    %1 = arith.truncf %0 : vector<200x1000xf32> to vector<200x1000xbf16>
    %c0_1 = arith.constant 0 : index
    %c0_2 = arith.constant 0 : index
    %2 = vector.load %arg2[%c0_1, %c0_2] : memref<1000x32xbf16, #tpu.memory_space<vmem>>, vector<1000x32xbf16>
    %cst = arith.constant dense<0.000000e+00> : vector<200x32xf32>
    %3 = tpu.matmul %1, %2, %cst {dimension_numbers = #tpu.dot_dimension_numbers<[1], [0], [0], [1], [0, 0, 1, 1], [], []>} : vector<200x1000xbf16>, vector<1000x32xbf16>, vector<200x32xf32> -> vector<200x32xf32>
    %c0_3 = arith.constant 0 : index
    %c0_4 = arith.constant 0 : index
    %4 = vector.load %arg3[%c0_3, %c0_4] : memref<1x32xf32, #tpu.memory_space<vmem>>, vector<1x32xf32>
    %5 = vector.broadcast %4 : vector<1x32xf32> to vector<200x32xf32>
    %6 = arith.addf %3, %5 : vector<200x32xf32>
    %cst_5 = arith.constant 0.000000e+00 : f32
    %7 = vector.broadcast %cst_5 : f32 to vector<200x32xf32>
    %8 = arith.maximumf %6, %7 : vector<200x32xf32>
    %c0_6 = arith.constant 0 : index
    %c0_7 = arith.constant 0 : index
    %9 = vector.load %arg4[%c0_6, %c0_7] : memref<1x32xf32, #tpu.memory_space<vmem>>, vector<1x32xf32>
    %10 = vector.broadcast %9 : vector<1x32xf32> to vector<200x32xf32>
    %11 = arith.mulf %8, %10 : vector<200x32xf32>
    %cst_8 = arith.constant dense<0.000000e+00> : vector<200xf32>
    %12 = vector.multi_reduction <add>, %11, %cst_8 [1] : vector<200x32xf32> to vector<200xf32>
    %13 = vector.shape_cast %12 : vector<200xf32> to vector<200x1xf32>
    %c0_9 = arith.constant 0 : index
    %c0_10 = arith.constant 0 : index
    %14 = memref.load %arg5[%c0_9, %c0_10] : memref<1x1xf32, #tpu.memory_space<smem>>
    %15 = vector.broadcast %14 : f32 to vector<200x1xf32>
    %16 = arith.addf %13, %15 : vector<200x1xf32>
    %17 = arith.negf %16 : vector<200x1xf32>
    %18 = math.exp %17 : vector<200x1xf32>
    %cst_11 = arith.constant 1.000000e+00 : f32
    %19 = vector.broadcast %cst_11 : f32 to vector<200x1xf32>
    %20 = arith.addf %19, %18 : vector<200x1xf32>
    %21 = arith.divf %19, %20 : vector<200x1xf32>
    %c0_12 = arith.constant 0 : index
    %c0_13 = arith.constant 0 : index
    %22 = vector.load %arg6[%c0_12, %c0_13] : memref<200x1xf32, #tpu.memory_space<vmem>>, vector<200x1xf32>
    tpu.vector_store %arg6[%c0_12, %c0_13], %21 {strides = array<i32>} : memref<200x1xf32, #tpu.memory_space<vmem>>, vector<200x1xf32>,
    return
  }
  func.func @transform_0(%arg0: i32) -> (i32, i32) {
    %c0_i32 = arith.constant 0 : i32
    %c0_i32_0 = arith.constant 0 : i32
    return %arg0, %c0_i32 : i32, i32
  }
  func.func @transform_1(%arg0: i32) -> (i32, i32) {
    %c0_i32 = arith.constant 0 : i32
    %c0_i32_0 = arith.constant 0 : i32
    %c0_i32_1 = arith.constant 0 : i32
    return %c0_i32, %c0_i32_0 : i32, i32
  }
  func.func @transform_2(%arg0: i32) -> (i32, i32) {
    %c0_i32 = arith.constant 0 : i32
    %c0_i32_0 = arith.constant 0 : i32
    %c0_i32_1 = arith.constant 0 : i32
    return %c0_i32, %c0_i32_0 : i32, i32
  }
  func.func @transform_3(%arg0: i32) -> (i32, i32) {
    %c0_i32 = arith.constant 0 : i32
    %c0_i32_0 = arith.constant 0 : i32
    %c0_i32_1 = arith.constant 0 : i32
    return %c0_i32, %c0_i32_0 : i32, i32
  }
  func.func @transform_4(%arg0: i32) -> (i32, i32) {
    %c0_i32 = arith.constant 0 : i32
    %c0_i32_0 = arith.constant 0 : i32
    %c0_i32_1 = arith.constant 0 : i32
    return %c0_i32, %c0_i32_0 : i32, i32
  }
  func.func @transform_5(%arg0: i32) -> (i32, i32) {
    %c0_i32 = arith.constant 0 : i32
    %c0_i32_0 = arith.constant 0 : i32
    return %arg0, %c0_i32 : i32, i32
  }
}

</mosaic_0001>

<bundles_post_ra>
// kernel: tpu_custom_call.1
= control target key start
LH: loop header
LB: loop body
LE: loop exit
PB: predicated region body
PF: predicated region fallthrough
CT: control target
= control target key end

     0   :  { %11 = vsyncpa [#allocation4], 0  ;;  %s2352_s18 = smov [#allocation3]   ;;  %s2905_s0 = inlined_call_operand.hbm [shape: f32[200,1000], index: 0, kind: input, shape index: {}]   ;;  %s2906_s1 = inlined_call_operand.vmem [shape: bf16[1000,32], index: 1, kind: input, shape index: {}]   ;;  %s2907_s2 = inlined_call_operand.vmem [shape: f32[1,32], index: 2, kind: input, shape index: {}]   ;;  %s2908_s3 = inlined_call_operand.vmem [shape: f32[1,32], index: 3, kind: input, shape index: {}]   ;;  %s2909_s4 = inlined_call_operand.<no memory space> [shape: f32[1,1], index: 4, kind: input, shape index: {}]   ;;  %s2910_s5 = inlined_call_operand.vmem [shape: f32[200,1], index: 5, kind: output, shape index: {}]  }
   0x1   :  { %s17_s19 = sshll.u32 %s2352_s18, 4  ;;  %s2328_s22 = scalar_lea.hbm %s2905_s0, 25600  ;;  %s18_s19 = int_to_ptr.vmem [resolvable:$true] %s17_s19 }
   0x2   :  { %p2329_p0 = scmp.ne.s32.totalorder %s2905_s0, %s2328_s22  ;;  %p2332_p1 = scmp.lt.u32.totalorder %s2328_s22, %s2905_s0 }
   0x4   :  { %p2334_p2 = pnand %p2332_p1, %p2329_p0 }
   0x6   :  { %2337 = shalt.err (!%p2334_p2)
}
   0x7   :  { %s2338_s27 = scalar_lea.vmem %s18_s19, 25600  ;;  %p2343_p4 = scmp.lt.s32.totalorder %s18_s19, %s18_s19 }
   0x8   :  { %p2339_p3 = scmp.ne.s32.totalorder %s18_s19, %s2338_s27  ;;  %p2344_p5 = scmp.lt.s32.totalorder %s2338_s27, %s2338_s27 }
   0xa   :  { %p2345_p6 = por %p2344_p5, %p2343_p4 }
   0xc   :  { %p2346_p7 = pnand %p2345_p6, %p2339_p3 }
   0xe   :  { %2349 = shalt.err (!%p2346_p7)
}
   0xf   :  { %s2353_s28 = smov 1024   ;;  %s2354_s29 = smov 64  }
  0x10   :  { %23 = dma.hbm_to_vmem [thread:$0]  %s2905_s0, 25600, %s18_s19, [#allocation4], %s2353_s28, %s2353_s28, %s2354_s29  }
  0x11   :  { %2350 = dma.done.wait [#allocation4], 25600  }
  0x12   :  { %2351 = vsyncadd [#allocation4], 4294941696  ;;  %v2165_v0 = vld [vmem:[%s2906_s1 + $0x40] sm:$0xff]   ;;  %v2169_v4 = vld [vmem:[%s2906_s1 + $0x48] sm:$0xff]   ;;  %v2355_v43 = vmov 0   ;;  %vm887_vm0 = vcmask 1043456  }
  0x13   :  { %v2166_v1 = vld [vmem:[%s2906_s1] sm:$0xff]   ;;  %1879 = vmatprep.subr.bf16.mxu0 %v2165_v0  ;;  %v2170_v5 = vld [vmem:[%s2906_s1 + $0x8] sm:$0xff]   ;;  %v2173_v8 = vld [vmem:[%s2906_s1 + $0x50] sm:$0xff]   ;;  %vm847_vm1 = vcmask 850944   ;;  %vm1492_vm2 = vcmask 261120   ;;  %vm1745_vm3 = vcmask 7168  }
  0x14   :  { %v2167_v2 = vld [vmem:[%s2906_s1 + $0xc0] sm:$0xff]   ;;  %1880 = vmatpush3.bf16.msra.mxu0 %v2166_v1  ;;  %v2171_v6 = vld [vmem:[%s2906_s1 + $0xc8] sm:$0xff]   ;;  %v2174_v9 = vld [vmem:[%s2906_s1 + $0x10] sm:$0xff]  }
  0x15   :  { %v2168_v3 = vld [vmem:[%s2906_s1 + $0x80] sm:$0xff]   ;;  %1973 = vmatprep.subr.bf16.mxu1 %v2167_v2  ;;  %1881 = vmatprep.subr.bf16.mxu0 %v2169_v4  ;;  %v2172_v7 = vld [vmem:[%s2906_s1 + $0x88] sm:$0xff]   ;;  %v2175_v10 = vld [vmem:[%s2906_s1 + $0xd0] sm:$0xff]  }
  0x16   :  { %1974 = vmatpush3.bf16.msra.mxu1 %v2168_v3  ;;  %v2176_v11 = vld [vmem:[%s2906_s1 + $0x90] sm:$0xff]   ;;  %v2177_v12 = vld [vmem:[%s2906_s1 + $0x58] sm:$0xff]   ;;  %v2181_v16 = vld [vmem:[%s2906_s1 + $0x60] sm:$0xff]  }
  0x17   :  { %1975 = vmatprep.subr.bf16.mxu1 %v2171_v6  ;;  %v2178_v13 = vld [vmem:[%s2906_s1 + $0x18] sm:$0xff]   ;;  %v2182_v17 = vld [vmem:[%s2906_s1 + $0x20] sm:$0xff]   ;;  %v2185_v20 = vld [vmem:[%s2906_s1 + $0x68] sm:$0xff]  }
  0x18   :  { %1882 = vmatpush3.bf16.msra.mxu0 %v2170_v5  ;;  %v2179_v14 = vld [vmem:[%s2906_s1 + $0xd8] sm:$0xff]   ;;  %v2183_v18 = vld [vmem:[%s2906_s1 + $0xe0] sm:$0xff]   ;;  %v2186_v21 = vld [vmem:[%s2906_s1 + $0x28] sm:$0xff]  }
  0x19   :  { %1883 = vmatprep.subr.bf16.mxu0 %v2173_v8  ;;  %v2180_v15 = vld [vmem:[%s2906_s1 + $0x98] sm:$0xff]   ;;  %v2184_v19 = vld [vmem:[%s2906_s1 + $0xa0] sm:$0xff]   ;;  %v2187_v22 = vld [vmem:[%s2906_s1 + $0xe8] sm:$0xff]  }
  0x1a   :  { %1976 = vmatpush3.bf16.msra.mxu1 %v2172_v7  ;;  %v2188_v23 = vld [vmem:[%s2906_s1 + $0xa8] sm:$0xff]   ;;  %v2189_v24 = vld [vmem:[%s2906_s1 + $0x70] sm:$0xff]   ;;  %v2193_v28 = vld [vmem:[%s2906_s1 + $0x78] sm:$0xff]  }
  0x1b   :  { %1977 = vmatprep.subr.bf16.mxu1 %v2175_v10  ;;  %v2190_v25 = vld [vmem:[%s2906_s1 + $0x30] sm:$0xff]   ;;  %v2194_v29 = vld [vmem:[%s2906_s1 + $0x38] sm:$0xff]   ;;  %v37_v31 = vld [vmem:[#allocation3 + $0x8] sm:$0xff] }
  0x1c   :  { %1884 = vmatpush3.bf16.msra.mxu0 %v2174_v9  ;;  %v2191_v26 = vld [vmem:[%s2906_s1 + $0xf0] sm:$0xff]   ;;  %v2195_v30 = vld [vmem:[%s2906_s1 + $0xf8] sm:$0xff]   ;;  %v45_v32 = vld [vmem:[#allocation3 + $0x48] sm:$0xff] }
  0x1d   :  { %1885 = vmatprep.subr.bf16.mxu0 %v2177_v12  ;;  %v2192_v27 = vld [vmem:[%s2906_s1 + $0xb0] sm:$0xff]   ;;  %v237_v33 = vpack.c.bf16 %v45_v32, %v37_v31  ;;  %v2196_v34 = vld [vmem:[%s2906_s1 + $0xb8] sm:$0xff]   ;;  %v36_v35 = vld [vmem:[#allocation3] sm:$0xff] }
  0x1e   :  { %1978 = vmatpush3.bf16.msra.mxu1 %v2176_v11  ;;  %v44_v36 = vld [vmem:[#allocation3 + $0x40] sm:$0xff]  ;;  %v39_v39 = vld [vmem:[#allocation3 + $0x18] sm:$0xff]  ;;  %v38_v44 = vld [vmem:[#allocation3 + $0x10] sm:$0xff] }
  0x1f   :  { %1979 = vmatprep.subr.bf16.mxu1 %v2179_v14  ;;  %923 = vmatprep.mubr.bf16.mxu0 %v237_v33  ;;  %v236_v37 = vpack.c.bf16 %v44_v36, %v36_v35  ;;  %v2197_v38 = vld [vmem:[%s2906_s1 + $0x140] sm:$0xff]   ;;  %v47_v40 = vld [vmem:[#allocation3 + $0x58] sm:$0xff]  ;;  %v46_v45 = vld [vmem:[#allocation3 + $0x50] sm:$0xff] }
  0x20   :  { %1886 = vmatpush3.bf16.msra.mxu0 %v2178_v13  ;;  %v239_v41 = vpack.c.bf16 %v47_v40, %v39_v39  ;;  %v2198_v42 = vld [vmem:[%s2906_s1 + $0x100] sm:$0xff]   ;;  %v238_v46 = vpack.c.bf16 %v46_v45, %v38_v44  ;;  %v53_v48 = vld [vmem:[#allocation3 + $0x88] sm:$0xff]  ;;  %v55_v53 = vld [vmem:[#allocation3 + $0x98] sm:$0xff] }
  0x21   :  { %1887 = vmatprep.subr.bf16.mxu0 %v2181_v16  ;;  %v2199_v47 = vld [vmem:[%s2906_s1 + $0x180] sm:$0xff]   ;;  %v61_v49 = vld [vmem:[#allocation3 + $0xc8] sm:$0xff]  ;;  %v63_v54 = vld [vmem:[#allocation3 + $0xd8] sm:$0xff] }
  0x22   :  { %1980 = vmatpush3.bf16.msra.mxu1 %v2180_v15  ;;  %1059 = vmatprep.mubr.bf16.mxu1 %v239_v41  ;;  %v52_v50 = vld [vmem:[#allocation3 + $0x80] sm:$0xff]  ;;  %v245_v52 = vpack.c.bf16 %v61_v49, %v53_v48  ;;  %v54_v55 = vld [vmem:[#allocation3 + $0x90] sm:$0xff]  ;;  %v247_v57 = vpack.c.bf16 %v63_v54, %v55_v53  ;;  %v2200_v59 = vld [vmem:[%s2906_s1 + $0x148] sm:$0xff]  }
  0x23   :  { %1981 = vmatprep.subr.bf16.mxu1 %v2183_v18  ;;  %v60_v51 = vld [vmem:[#allocation3 + $0xc0] sm:$0xff]  ;;  %v62_v58 = vld [vmem:[#allocation3 + $0xd0] sm:$0xff]  ;;  %v2201_v60 = vld [vmem:[%s2906_s1 + $0x188] sm:$0xff]  }
  0x24   :  { %1888 = vmatpush3.bf16.msra.mxu0 %v2182_v17  ;;  %v244_v56 = vpack.c.bf16 %v60_v51, %v52_v50  ;;  %v246_v61 = vpack.c.bf16 %v62_v58, %v54_v55  ;;  %v2202_v62 = vld [vmem:[%s2906_s1 + $0x108] sm:$0xff]   ;;  %v71_v2 = vld [vmem:[#allocation3 + $0x118] sm:$0xff]  ;;  %v68_v3 = vld [vmem:[#allocation3 + $0x100] sm:$0xff] }
  0x25   :  { %1889 = vmatprep.subr.bf16.mxu0 %v2185_v20  ;;  %v69_v63 = vld [vmem:[#allocation3 + $0x108] sm:$0xff]  ;;  %v76_v4 = vld [vmem:[#allocation3 + $0x140] sm:$0xff]  ;;  %v79_v5 = vld [vmem:[#allocation3 + $0x158] sm:$0xff] }
  0x26   :  { %1982 = vmatpush3.bf16.msra.mxu1 %v2184_v19  ;;  %v77_v0 = vld [vmem:[#allocation3 + $0x148] sm:$0xff]  ;;  %v255_v6 = vpack.c.bf16 %v79_v5, %v71_v2  ;;  %v2203_v7 = vld [vmem:[%s2906_s1 + $0x190] sm:$0xff]   ;;  %v252_v10 = vpack.c.bf16 %v76_v4, %v68_v3  ;;  %v87_v14 = vld [vmem:[#allocation3 + $0x198] sm:$0xff] }
  0x27   :  { %1983 = vmatprep.subr.bf16.mxu1 %v2187_v22  ;;  %v253_v1 = vpack.c.bf16 %v77_v0, %v69_v63  ;;  %v85_v8 = vld [vmem:[#allocation3 + $0x188] sm:$0xff]  ;;  %v70_v11 = vld [vmem:[#allocation3 + $0x110] sm:$0xff]  ;;  %v95_v15 = vld [vmem:[#allocation3 + $0x1d8] sm:$0xff] }
  0x28   :  { %1890 = vmatpush3.bf16.msra.mxu0 %v2186_v21  ;;  %v93_v9 = vld [vmem:[#allocation3 + $0x1c8] sm:$0xff]  ;;  %v78_v12 = vld [vmem:[#allocation3 + $0x150] sm:$0xff]  ;;  %v263_v19 = vpack.c.bf16 %v95_v15, %v87_v14  ;;  %v2206_v20 = vld [vmem:[%s2906_s1 + $0x198] sm:$0xff]  }
  0x29   :  { %1891 = vmatprep.subr.bf16.mxu0 %v2189_v24  ;;  %v261_v13 = vpack.c.bf16 %v93_v9, %v85_v8  ;;  %v2204_v16 = vld [vmem:[%s2906_s1 + $0x150] sm:$0xff]   ;;  %v254_v17 = vpack.c.bf16 %v78_v12, %v70_v11  ;;  %v84_v21 = vld [vmem:[#allocation3 + $0x180] sm:$0xff]  ;;  %v101_v24 = vld [vmem:[#allocation3 + $0x208] sm:$0xff] }
  0x2a   :  { %1984 = vmatpush3.bf16.msra.mxu1 %v2188_v23  ;;  %v2205_v18 = vld [vmem:[%s2906_s1 + $0x110] sm:$0xff]   ;;  %v92_v22 = vld [vmem:[#allocation3 + $0x1c0] sm:$0xff]  ;;  %v2208_v32 = vld [vmem:[%s2906_s1 + $0x158] sm:$0xff]  }
  0x2b   :  { %1985 = vmatprep.subr.bf16.mxu1 %v2191_v26  ;;  %v86_v23 = vld [vmem:[#allocation3 + $0x190] sm:$0xff]  ;;  %v100_v36 = vld [vmem:[#allocation3 + $0x200] sm:$0xff]  ;;  %v117_v39 = vld [vmem:[#allocation3 + $0x288] sm:$0xff] }
  0x2c   :  { %1892 = vmatpush3.bf16.msra.mxu0 %v2190_v25  ;;  %v109_v25 = vld [vmem:[#allocation3 + $0x248] sm:$0xff]  ;;  %v94_v26 = vld [vmem:[#allocation3 + $0x1d0] sm:$0xff]  ;;  %v127_v48 = vld [vmem:[#allocation3 + $0x2d8] sm:$0xff] }
  0x2d   :  { %1893 = vmatprep.subr.bf16.mxu0 %v2193_v28  ;;  %v103_v28 = vld [vmem:[#allocation3 + $0x218] sm:$0xff]  ;;  %v269_v31 = vpack.c.bf16 %v109_v25, %v101_v24  ;;  %v262_v33 = vpack.c.bf16 %v94_v26, %v86_v23  ;;  %v125_v40 = vld [vmem:[#allocation3 + $0x2c8] sm:$0xff]  ;;  %v110_v44 = vld [vmem:[#allocation3 + $0x250] sm:$0xff] }
  0x2e   :  { %1986 = vmatpush3.bf16.msra.mxu1 %v2192_v27  ;;  %v260_v27 = vpack.c.bf16 %v92_v22, %v84_v21  ;;  %v2211_v45 = vld [vmem:[%s2906_s1 + $0x1b0] sm:$0xff]   ;;  %v2212_v49 = vld [vmem:[%s2906_s1 + $0x160] sm:$0xff]   ;;  %v2214_v55 = vld [vmem:[%s2906_s1 + $0x1b8] sm:$0xff]  }
  0x2f   :  { %1987 = vmatprep.subr.bf16.mxu1 %v2195_v30  ;;  %v2207_v30 = vld [vmem:[%s2906_s1 + $0x1a0] sm:$0xff]   ;;  %v135_v63 = vld [vmem:[#allocation3 + $0x318] sm:$0xff]  ;;  %v2216_v4 = vld [vmem:[%s2906_s1 + $0x168] sm:$0xff]  }
  0x30   :  { %1894 = vmatpush3.bf16.msra.mxu0 %v2194_v29  ;;  %v111_v29 = vld [vmem:[#allocation3 + $0x258] sm:$0xff]  ;;  %v2213_v51 = vld [vmem:[%s2906_s1 + $0x120] sm:$0xff]   ;;  %v149_v8 = vld [vmem:[#allocation3 + $0x388] sm:$0xff] }
  0x31   :  { %2067 = vmatprep.subr.bf16.mxu0 %v2197_v38  ;;  %v271_v35 = vpack.c.bf16 %v111_v29, %v103_v28  ;;  %v2210_v38 = vld [vmem:[%s2906_s1 + $0x1a8] sm:$0xff]   ;;  %v116_v53 = vld [vmem:[#allocation3 + $0x280] sm:$0xff]  ;;  %v143_v0 = vld [vmem:[#allocation3 + $0x358] sm:$0xff] }
  0x32   :  { %1988 = vmatpush3.bf16.msra.mxu1 %v2196_v34  ;;  %v2209_v34 = vld [vmem:[%s2906_s1 + $0x118] sm:$0xff]   ;;  %v124_v54 = vld [vmem:[#allocation3 + $0x2c0] sm:$0xff]  ;;  %v287_v5 = vpack.c.bf16 %v143_v0, %v135_v63  ;;  %v157_v9 = vld [vmem:[#allocation3 + $0x3c8] sm:$0xff] }
  0x33   :  { %1299 = vmatprep.subr.bf16.mxu1 %v2355_v43  ;;  %924 = vmatmul.mubr.bf16.vlgmr.msra.gmra.mrb[0].mxu0 %v236_v37  ;;  %v108_v37 = vld [vmem:[#allocation3 + $0x240] sm:$0xff]  ;;  %v276_v58 = vpack.c.bf16 %v124_v54, %v116_v53  ;;  %v142_v11 = vld [vmem:[#allocation3 + $0x350] sm:$0xff]  ;;  %v159_v14 = vld [vmem:[#allocation3 + $0x3d8] sm:$0xff]  ;;  %v293_v15 = vpack.c.bf16 %v157_v9, %v149_v8 }
  0x34   :  { %2068 = vmatpush3.bf16.msra.mxu0 %v2198_v42  ;;  %931 = vmatprep.mubr.bf16.mxu0 %v245_v52  ;;  %v268_v41 = vpack.c.bf16 %v108_v37, %v100_v36  ;;  %v102_v42 = vld [vmem:[#allocation3 + $0x210] sm:$0xff]  ;;  %v132_v2 = vld [vmem:[#allocation3 + $0x300] sm:$0xff]  ;;  %v165_v23 = vld [vmem:[#allocation3 + $0x408] sm:$0xff] }
  0x35   :  { %1060 = vmatmul.mubr.bf16.vlgmr.msra.gmra.mrb[0].mxu1 %v238_v46  ;;  %2069 = vmatprep.subr.bf16.mxu0 %v2200_v59  ;;  %v277_v46 = vpack.c.bf16 %v125_v40, %v117_v39  ;;  %v270_v50 = vpack.c.bf16 %v110_v44, %v102_v42  ;;  %v118_v59 = vld [vmem:[#allocation3 + $0x290] sm:$0xff]  ;;  %v140_v3 = vld [vmem:[#allocation3 + $0x340] sm:$0xff]  ;;  %v173_v24 = vld [vmem:[#allocation3 + $0x448] sm:$0xff] }
  0x36   :  { %1300 = vmatpush1.bf16.msra.mxu1 %v2199_v47  ;;  %1067 = vmatprep.mubr.bf16.mxu1 %v247_v57  ;;  %v119_v47 = vld [vmem:[#allocation3 + $0x298] sm:$0xff]  ;;  %v141_v57 = vld [vmem:[#allocation3 + $0x348] sm:$0xff]  ;;  %v284_v12 = vpack.c.bf16 %v140_v3, %v132_v2  ;;  %v148_v21 = vld [vmem:[#allocation3 + $0x380] sm:$0xff]  ;;  %v301_v29 = vpack.c.bf16 %v173_v24, %v165_v23 }
  0x37   :  { %1301 = vmatprep.subr.bf16.mxu1 %v2355_v43  ;;  %v279_v52 = vpack.c.bf16 %v127_v48, %v119_v47  ;;  %v156_v22 = vld [vmem:[#allocation3 + $0x3c0] sm:$0xff]  ;;  %v2222_v25 = vld [vmem:[%s2906_s1 + $0x1d8] sm:$0xff]   ;;  %v158_v28 = vld [vmem:[#allocation3 + $0x3d0] sm:$0xff] }
  0x38   :  { %2070 = vmatpush3.bf16.msra.mxu0 %v2202_v62  ;;  %v292_v26 = vpack.c.bf16 %v156_v22, %v148_v21  ;;  %v2225_v37 = vld [vmem:[%s2906_s1 + $0x138] sm:$0xff]   ;;  %v181_v39 = vld [vmem:[#allocation3 + $0x488] sm:$0xff]  ;;  %v166_v44 = vld [vmem:[#allocation3 + $0x410] sm:$0xff] }
  0x39   :  { %2071 = vmatprep.subr.bf16.mxu0 %v2204_v16  ;;  %v2219_v16 = vld [vmem:[%s2906_s1 + $0x1d0] sm:$0xff]   ;;  %v189_v40 = vld [vmem:[#allocation3 + $0x4c8] sm:$0xff]  ;;  %v183_v47 = vld [vmem:[#allocation3 + $0x498] sm:$0xff] }
  0x3a   :  { %1302 = vmatpush1.bf16.msra.mxu1 %v2201_v60  ;;  %v126_v60 = vld [vmem:[#allocation3 + $0x2d0] sm:$0xff]  ;;  %v191_v48 = vld [vmem:[#allocation3 + $0x4d8] sm:$0xff]  ;;  %v180_v53 = vld [vmem:[#allocation3 + $0x480] sm:$0xff] }
  0x3b   :  { %932 = vmatmul.mubr.bf16.gmra.mrb[4].mxu0 %v244_v56  ;;  %1303 = vmatprep.subr.bf16.mxu1 %v2355_v43  ;;  %v133_v56 = vld [vmem:[#allocation3 + $0x308] sm:$0xff]  ;;  %v188_v54 = vld [vmem:[#allocation3 + $0x4c0] sm:$0xff]  ;;  %v215_v8 = vld [vmem:[#allocation3 + $0x598] sm:$0xff] }
  0x3c   :  { %939 = vmatprep.mubr.bf16.mxu0 %v253_v1  ;;  %2072 = vmatpush3.bf16.msra.mxu0 %v2205_v18  ;;  %v285_v62 = vpack.c.bf16 %v141_v57, %v133_v56  ;;  %v278_v1 = vpack.c.bf16 %v126_v60, %v118_v59  ;;  %v205_v56 = vld [vmem:[#allocation3 + $0x548] sm:$0xff]  ;;  %v308_v57 = vpack.c.bf16 %v188_v54, %v180_v53  ;;  %v190_v59 = vld [vmem:[#allocation3 + $0x4d0] sm:$0xff]  ;;  %v196_v0 = vld [vmem:[#allocation3 + $0x500] sm:$0xff] }
  0x3d   :  { %1068 = vmatmul.mubr.bf16.gmra.mrb[4].mxu1 %v246_v61  ;;  %2073 = vmatprep.subr.bf16.mxu0 %v2208_v32  ;;  %v2215_v61 = vld [vmem:[%s2906_s1 + $0x1c0] sm:$0xff]   ;;  %v213_v2 = vld [vmem:[#allocation3 + $0x588] sm:$0xff]  ;;  %v223_v9 = vld [vmem:[#allocation3 + $0x5d8] sm:$0xff] }
  0x3e   :  { %1075 = vmatprep.mubr.bf16.mxu1 %v255_v6  ;;  %1304 = vmatpush1.bf16.msra.mxu1 %v2203_v7  ;;  %v2217_v6 = vld [vmem:[%s2906_s1 + $0x128] sm:$0xff]   ;;  %v2223_v32 = vld [vmem:[%s2906_s1 + $0x1e0] sm:$0xff]   ;;  %v75_v53 = vld [vmem:[#allocation3 + $0x138] sm:$0xff] }
  0x3f   :  { %1305 = vmatprep.subr.bf16.mxu1 %v2355_v43  ;;  %v2218_v7 = vld [vmem:[%s2906_s1 + $0x1c8] sm:$0xff]   ;;  %v228_v22 = vld [vmem:[#allocation3 + $0x600] sm:$0xff]  ;;  %v83_v54 = vld [vmem:[#allocation3 + $0x178] sm:$0xff] }
  0x40   :  { %2074 = vmatpush3.bf16.msra.mxu0 %v2209_v34  ;;  %v164_v34 = vld [vmem:[#allocation3 + $0x400] sm:$0xff]  ;;  %v221_v3 = vld [vmem:[#allocation3 + $0x5c8] sm:$0xff] }
  0x41   :  { %2075 = vmatprep.subr.bf16.mxu0 %v2212_v49  ;;  %v2227_v49 = vld [vmem:[%s2906_s1 + $0x1f0] ss:$0 sps:$4 sm:$0xff]   ;;  %v41_v23 = vld [vmem:[#allocation3 + $0x28] sm:$0xff] }
  0x42   :  { %1306 = vmatpush1.bf16.msra.mxu1 %v2206_v20  ;;  %v2221_v20 = vld [vmem:[%s2906_s1 + $0x130] sm:$0xff]   ;;  %v49_v24 = vld [vmem:[#allocation3 + $0x68] sm:$0xff] }
  0x43   :  { %940 = vmatmul.mubr.bf16.gmra.mrb[8].mxu0 %v252_v10  ;;  %1307 = vmatprep.subr.bf16.mxu1 %v2355_v43  ;;  %v134_v10 = vld [vmem:[#allocation3 + $0x310] sm:$0xff] }
  0x44   :  { %947 = vmatprep.mubr.bf16.mxu0 %v261_v13  ;;  %2076 = vmatpush3.bf16.msra.mxu0 %v2213_v51  ;;  %v151_v13 = vld [vmem:[#allocation3 + $0x398] sm:$0xff]  ;;  %v286_v18 = vpack.c.bf16 %v142_v11, %v134_v10  ;;  %v889_v51 = vsel %vm887_vm0, %v2227_v49, 0  ;;  %v327_v11 = vpack.c.bf16 %v223_v9, %v215_v8  ;;  %v90_v9 = vld [vmem:[#allocation3 + $0x1b0] sm:$0xff] }
  0x45   :  { %1076 = vmatmul.mubr.bf16.gmra.mrb[8].mxu1 %v254_v17  ;;  %2077 = vmatprep.subr.bf16.mxu0 %v2216_v4  ;;  %v2220_v17 = vld [vmem:[%s2906_s1 + $0x170] sm:$0xff]  }
  0x46   :  { %1083 = vmatprep.mubr.bf16.mxu1 %v263_v19  ;;  %1308 = vmatpush1.bf16.msra.mxu1 %v2207_v30  ;;  %v295_v19 = vpack.c.bf16 %v159_v14, %v151_v13  ;;  %v167_v30 = vld [vmem:[#allocation3 + $0x418] sm:$0xff]  ;;  %v220_v13 = vld [vmem:[#allocation3 + $0x5c0] sm:$0xff]  ;;  %v229_v14 = vld [vmem:[#allocation3 + $0x608] sm:$0xff] }
  0x47   :  { %1309 = vmatprep.subr.bf16.mxu1 %v2355_v43 }
  0x48   :  { %2078 = vmatpush3.bf16.msra.mxu0 %v2217_v6  ;;  %v206_v6 = vld [vmem:[#allocation3 + $0x550] sm:$0xff] }
  0x49   :  { %2079 = vmatprep.subr.bf16.mxu0 %v2220_v17  ;;  %v222_v17 = vld [vmem:[#allocation3 + $0x5d0] sm:$0xff] }
  0x4a   :  { %1310 = vmatpush1.bf16.msra.mxu1 %v2210_v38  ;;  %v172_v38 = vld [vmem:[#allocation3 + $0x440] sm:$0xff] }
  0x4b   :  { %948 = vmatmul.mubr.bf16.gmra.mrb[12].mxu0 %v260_v27  ;;  %1311 = vmatprep.subr.bf16.mxu1 %v2355_v43  ;;  %v150_v27 = vld [vmem:[#allocation3 + $0x390] sm:$0xff]  ;;  %v300_v42 = vpack.c.bf16 %v172_v38, %v164_v34  ;;  %v57_v34 = vld [vmem:[#allocation3 + $0xa8] sm:$0xff] }
  0x4c   :  { %955 = vmatprep.mubr.bf16.mxu0 %v269_v31  ;;  %2080 = vmatpush3.bf16.msra.mxu0 %v2221_v20  ;;  %v175_v31 = vld [vmem:[#allocation3 + $0x458] sm:$0xff]  ;;  %v50_v38 = vld [vmem:[#allocation3 + $0x70] sm:$0xff] }
  0x4d   :  { %1084 = vmatmul.mubr.bf16.gmra.mrb[12].mxu1 %v262_v33  ;;  %v294_v33 = vpack.c.bf16 %v158_v28, %v150_v27  ;;  %v303_v36 = vpack.c.bf16 %v175_v31, %v167_v30  ;;  %v241_v27 = vpack.c.bf16 %v49_v24, %v41_v23  ;;  %v43_v28 = vld [vmem:[#allocation3 + $0x38] sm:$0xff] }
  0x4e   :  { %1091 = vmatprep.mubr.bf16.mxu1 %v271_v35  ;;  %1312 = vmatpush1.bf16.msra.mxu1 %v2211_v45  ;;  %v2224_v35 = vld [vmem:[%s2906_s1 + $0x178] sm:$0xff]   ;;  %v174_v45 = vld [vmem:[#allocation3 + $0x450] sm:$0xff] }
  0x4f   :  { %1313 = vmatprep.subr.bf16.mxu1 %v2355_v43  ;;  %2081 = vmatprep.subr.bf16.mxu0 %v2224_v35  ;;  %v65_v35 = vld [vmem:[#allocation3 + $0xe8] sm:$0xff]  ;;  %v123_v24 = vld [vmem:[#allocation3 + $0x2b8] sm:$0xff] }
  0x50   :  { %2082 = vmatpush3.bf16.msra.mxu0 %v2225_v37  ;;  %v42_v37 = vld [vmem:[#allocation3 + $0x30] sm:$0xff] }
  0x52   :  { %1314 = vmatpush1.bf16.msra.mxu1 %v2214_v55  ;;  %v197_v55 = vld [vmem:[#allocation3 + $0x508] sm:$0xff] }
  0x53   :  { %956 = vmatmul.mubr.bf16.gmra.mrb[16].mxu0 %v268_v41  ;;  %1315 = vmatprep.subr.bf16.mxu1 %v2355_v43  ;;  %v2226_v41 = vld [vmem:[%s2906_s1 + $0x1e8] sm:$0xff]   ;;  %v317_v60 = vpack.c.bf16 %v205_v56, %v197_v55  ;;  %v259_v56 = vpack.c.bf16 %v83_v54, %v75_v53  ;;  %v152_v53 = vld [vmem:[#allocation3 + $0x3a0] sm:$0xff] }
  0x54   :  { %963 = vmatprep.mubr.bf16.mxu0 %v277_v46  ;;  %v309_v46 = vpack.c.bf16 %v189_v40, %v181_v39  ;;  %v249_v39 = vpack.c.bf16 %v65_v35, %v57_v34  ;;  %v59_v40 = vld [vmem:[#allocation3 + $0xb8] sm:$0xff]  ;;  %v130_v34 = vld [vmem:[#allocation3 + $0x2f0] sm:$0xff]  ;;  %v160_v54 = vld [vmem:[#allocation3 + $0x3e0] sm:$0xff] }
  0x55   :  { %1092 = vmatmul.mubr.bf16.gmra.mrb[16].mxu1 %v270_v50  ;;  %v302_v50 = vpack.c.bf16 %v174_v45, %v166_v44  ;;  %v56_v45 = vld [vmem:[#allocation3 + $0xa0] sm:$0xff] }
  0x56   :  { %1099 = vmatprep.mubr.bf16.mxu1 %v279_v52  ;;  %1316 = vmatpush1.bf16.msra.mxu1 %v2215_v61  ;;  %v311_v52 = vpack.c.bf16 %v191_v48, %v183_v47  ;;  %v199_v61 = vld [vmem:[#allocation3 + $0x518] sm:$0xff]  ;;  %v73_v47 = vld [vmem:[#allocation3 + $0x128] sm:$0xff] }
  0x57   :  { %1317 = vmatprep.subr.bf16.mxu1 %v2355_v43  ;;  %v81_v48 = vld [vmem:[#allocation3 + $0x168] sm:$0xff] }
  0x5a   :  { %1318 = vmatpush1.bf16.msra.mxu1 %v2218_v7  ;;  %v325_v7 = vpack.c.bf16 %v221_v3, %v213_v2 }
  0x5b   :  { %964 = vmatmul.mubr.bf16.gmra.mrb[20].mxu0 %v276_v58  ;;  %1319 = vmatprep.subr.bf16.mxu1 %v2355_v43  ;;  %v182_v58 = vld [vmem:[#allocation3 + $0x490] sm:$0xff] }
  0x5c   :  { %971 = vmatprep.mubr.bf16.mxu0 %v285_v62  ;;  %v207_v62 = vld [vmem:[#allocation3 + $0x558] sm:$0xff]  ;;  %v310_v63 = vpack.c.bf16 %v190_v59, %v182_v58  ;;  %v80_v58 = vld [vmem:[#allocation3 + $0x160] sm:$0xff]  ;;  %v89_v59 = vld [vmem:[#allocation3 + $0x1a8] sm:$0xff] }
  0x5d   :  { %1100 = vmatmul.mubr.bf16.gmra.mrb[20].mxu1 %v278_v1  ;;  %v204_v1 = vld [vmem:[#allocation3 + $0x540] sm:$0xff] }
  0x5e   :  { %1107 = vmatprep.mubr.bf16.mxu1 %v287_v5  ;;  %1320 = vmatpush1.bf16.msra.mxu1 %v2219_v16  ;;  %v316_v4 = vpack.c.bf16 %v204_v1, %v196_v0  ;;  %v198_v5 = vld [vmem:[#allocation3 + $0x510] sm:$0xff]  ;;  %v91_v0 = vld [vmem:[#allocation3 + $0x1b8] sm:$0xff] }
  0x5f   :  { %1321 = vmatprep.subr.bf16.mxu1 %v2355_v43  ;;  %v318_v10 = vpack.c.bf16 %v206_v6, %v198_v5  ;;  %v214_v16 = vld [vmem:[#allocation3 + $0x590] sm:$0xff]  ;;  %v99_v1 = vld [vmem:[#allocation3 + $0x1f8] sm:$0xff]  ;;  %v96_v5 = vld [vmem:[#allocation3 + $0x1e0] sm:$0xff] }
  0x60   :  { %v326_v20 = vpack.c.bf16 %v222_v17, %v214_v16  ;;  %v267_v3 = vpack.c.bf16 %v99_v1, %v91_v0  ;;  %v105_v6 = vld [vmem:[#allocation3 + $0x228] sm:$0xff]  ;;  %v104_v16 = vld [vmem:[#allocation3 + $0x220] sm:$0xff] }
  0x61   :  { %v112_v17 = vld [vmem:[#allocation3 + $0x260] sm:$0xff] }
  0x62   :  { %1322 = vmatpush1.bf16.msra.mxu1 %v2222_v25  ;;  %v332_v25 = vpack.c.bf16 %v228_v22, %v228_v22  ;;  %v114_v22 = vld [vmem:[#allocation3 + $0x270] sm:$0xff]  ;;  %v168_v0 = vld [vmem:[#allocation3 + $0x420] sm:$0xff] }
  0x63   :  { %972 = vmatmul.mubr.bf16.gmra.mrb[24].mxu0 %v284_v12  ;;  %1323 = vmatprep.subr.bf16.mxu1 %v2355_v43  ;;  %v212_v12 = vld [vmem:[#allocation3 + $0x580] sm:$0xff] }
  0x64   :  { %979 = vmatprep.mubr.bf16.mxu0 %v293_v15  ;;  %v324_v15 = vpack.c.bf16 %v220_v13, %v212_v12  ;;  %v107_v12 = vld [vmem:[#allocation3 + $0x238] sm:$0xff]  ;;  %v176_v1 = vld [vmem:[#allocation3 + $0x460] sm:$0xff] }
  0x65   :  { %1108 = vmatmul.mubr.bf16.gmra.mrb[24].mxu1 %v286_v18  ;;  %v333_v18 = vpack.c.bf16 %v229_v14, %v229_v14  ;;  %v115_v13 = vld [vmem:[#allocation3 + $0x278] sm:$0xff] }
  0x66   :  { %1115 = vmatprep.mubr.bf16.mxu1 %v295_v19  ;;  %1324 = vmatpush1.bf16.msra.mxu1 %v2223_v32  ;;  %v231_v19 = vld [vmem:[#allocation3 + $0x618] sm:$0xff]  ;;  %v40_v32 = vld [vmem:[#allocation3 + $0x20] sm:$0xff] }
  0x67   :  { %1325 = vmatprep.subr.bf16.mxu1 %v2355_v43  ;;  %v335_v21 = vpack.c.bf16 %v231_v19, %v231_v19  ;;  %v129_v19 = vld [vmem:[#allocation3 + $0x2e8] sm:$0xff] }
  0x6a   :  { %1326 = vmatpush1.bf16.msra.mxu1 %v2226_v41  ;;  %v67_v41 = vld [vmem:[#allocation3 + $0xf8] sm:$0xff] }
  0x6b   :  { %980 = vmatmul.mubr.bf16.gmra.mrb[28].mxu0 %v292_v26  ;;  %1327 = vmatprep.subr.bf16.mxu1 %v2355_v43  ;;  %v319_v43 = vpack.c.bf16 %v207_v62, %v199_v61  ;;  %v230_v26 = vld [vmem:[#allocation3 + $0x610] sm:$0xff]  ;;  %v251_v44 = vpack.c.bf16 %v67_v41, %v59_v40  ;;  %v136_v40 = vld [vmem:[#allocation3 + $0x320] sm:$0xff] }
  0x6c   :  { %987 = vmatprep.mubr.bf16.mxu0 %v301_v29  ;;  %v51_v29 = vld [vmem:[#allocation3 + $0x78] sm:$0xff]  ;;  %v334_v30 = vpack.c.bf16 %v230_v26, %v230_v26  ;;  %v74_v62 = vld [vmem:[#allocation3 + $0x130] sm:$0xff]  ;;  %v144_v41 = vld [vmem:[#allocation3 + $0x360] sm:$0xff] }
  0x6d   :  { %1116 = vmatmul.mubr.bf16.gmra.mrb[28].mxu1 %v294_v33  ;;  %v243_v31 = vpack.c.bf16 %v51_v29, %v43_v28  ;;  %v48_v33 = vld [vmem:[#allocation3 + $0x60] sm:$0xff] }
  0x6e   :  { %1123 = vmatprep.mubr.bf16.mxu1 %v303_v36  ;;  %1328 = vmatpush1.bf16.msra.mxu1 %v889_v51  ;;  %v240_v36 = vpack.c.bf16 %v48_v33, %v40_v32  ;;  %v66_v51 = vld [vmem:[#allocation3 + $0xf0] sm:$0xff]  ;;  %v120_v28 = vld [vmem:[#allocation3 + $0x2a0] sm:$0xff] }
  0x6f   :  { %v128_v29 = vld [vmem:[#allocation3 + $0x2e0] sm:$0xff]  ;;  %v122_v33 = vld [vmem:[#allocation3 + $0x2b0] sm:$0xff] }
  0x70   :  { %v280_v32 = vpack.c.bf16 %v128_v29, %v120_v28  ;;  %v202_v29 = vld [vmem:[#allocation3 + $0x530] sm:$0xff] }
  0x73   :  { %988 = vmatmul.mubr.bf16.gmra.mrb[32].mxu0 %v300_v42  ;;  %v242_v42 = vpack.c.bf16 %v50_v38, %v42_v37  ;;  %v147_v37 = vld [vmem:[#allocation3 + $0x378] sm:$0xff]  ;;  %v282_v38 = vpack.c.bf16 %v130_v34, %v122_v33 }
  0x74   :  { %995 = vmatprep.mubr.bf16.mxu0 %v309_v46  ;;  %v64_v46 = vld [vmem:[#allocation3 + $0xe0] sm:$0xff]  ;;  %v227_v33 = vld [vmem:[#allocation3 + $0x5f8] sm:$0xff] }
  0x75   :  { %1124 = vmatmul.mubr.bf16.gmra.mrb[32].mxu1 %v302_v50  ;;  %v248_v49 = vpack.c.bf16 %v64_v46, %v56_v45  ;;  %v58_v50 = vld [vmem:[#allocation3 + $0xb0] sm:$0xff]  ;;  %v288_v45 = vpack.c.bf16 %v144_v41, %v136_v40 }
  0x76   :  { %1131 = vmatprep.mubr.bf16.mxu1 %v311_v52  ;;  %v257_v52 = vpack.c.bf16 %v81_v48, %v73_v47  ;;  %v250_v55 = vpack.c.bf16 %v66_v51, %v58_v50  ;;  %v138_v46 = vld [vmem:[#allocation3 + $0x330] sm:$0xff]  ;;  %v163_v50 = vld [vmem:[#allocation3 + $0x3f8] sm:$0xff] }
  0x77   :  { %v146_v47 = vld [vmem:[#allocation3 + $0x370] sm:$0xff] }
  0x78   :  { %v290_v51 = vpack.c.bf16 %v146_v47, %v138_v46  ;;  %v218_v40 = vld [vmem:[#allocation3 + $0x5b0] sm:$0xff]  ;;  %v232_v47 = vld [vmem:[#allocation3 + $0x620] sm:$0xff] }
  0x79   :  { %v226_v41 = vld [vmem:[#allocation3 + $0x5f0] sm:$0xff] }
  0x7b   :  { %996 = vmatmul.mubr.bf16.gmra.mrb[36].mxu0 %v308_v57  ;;  %v72_v57 = vld [vmem:[#allocation3 + $0x120] sm:$0xff] }
  0x7c   :  { %1003 = vmatprep.mubr.bf16.mxu0 %v317_v60  ;;  %v97_v60 = vld [vmem:[#allocation3 + $0x1e8] sm:$0xff]  ;;  %v256_v61 = vpack.c.bf16 %v80_v58, %v72_v57  ;;  %v296_v57 = vpack.c.bf16 %v160_v54, %v152_v53  ;;  %v154_v58 = vld [vmem:[#allocation3 + $0x3b0] sm:$0xff] }
  0x7d   :  { %1132 = vmatmul.mubr.bf16.gmra.mrb[36].mxu1 %v310_v63  ;;  %v82_v63 = vld [vmem:[#allocation3 + $0x170] sm:$0xff] }
  0x7e   :  { %1139 = vmatprep.mubr.bf16.mxu1 %v319_v43  ;;  %v265_v43 = vpack.c.bf16 %v97_v60, %v89_v59  ;;  %v258_v2 = vpack.c.bf16 %v82_v63, %v74_v62  ;;  %v162_v59 = vld [vmem:[#allocation3 + $0x3f0] sm:$0xff]  ;;  %v179_v62 = vld [vmem:[#allocation3 + $0x478] sm:$0xff] }
  0x7f   :  { %v298_v63 = vpack.c.bf16 %v162_v59, %v154_v58 }
  0x83   :  { %1004 = vmatmul.mubr.bf16.gmra.mrb[40].mxu0 %v316_v4  ;;  %v88_v4 = vld [vmem:[#allocation3 + $0x1a0] sm:$0xff] }
  0x84   :  { %1011 = vmatprep.mubr.bf16.mxu0 %v325_v7  ;;  %v113_v7 = vld [vmem:[#allocation3 + $0x268] sm:$0xff]  ;;  %v264_v8 = vpack.c.bf16 %v96_v5, %v88_v4  ;;  %v304_v4 = vpack.c.bf16 %v176_v1, %v168_v0  ;;  %v170_v5 = vld [vmem:[#allocation3 + $0x430] sm:$0xff] }
  0x85   :  { %1140 = vmatmul.mubr.bf16.gmra.mrb[40].mxu1 %v318_v10  ;;  %v98_v10 = vld [vmem:[#allocation3 + $0x1f0] sm:$0xff] }
  0x86   :  { %1147 = vmatprep.mubr.bf16.mxu1 %v327_v11  ;;  %v273_v11 = vpack.c.bf16 %v113_v7, %v105_v6  ;;  %v266_v14 = vpack.c.bf16 %v98_v10, %v90_v9  ;;  %v178_v6 = vld [vmem:[#allocation3 + $0x470] sm:$0xff]  ;;  %v195_v9 = vld [vmem:[#allocation3 + $0x4f8] sm:$0xff] }
  0x87   :  { %v306_v10 = vpack.c.bf16 %v178_v6, %v170_v5 }
  0x8b   :  { %1012 = vmatmul.mubr.bf16.gmra.mrb[44].mxu0 %v324_v15  ;;  %v275_v15 = vpack.c.bf16 %v115_v13, %v107_v12  ;;  %v184_v12 = vld [vmem:[#allocation3 + $0x4a0] sm:$0xff] }
  0x8c   :  { %1019 = vmatprep.mubr.bf16.mxu0 %v333_v18  ;;  %v121_v18 = vld [vmem:[#allocation3 + $0x2a8] sm:$0xff]  ;;  %v192_v13 = vld [vmem:[#allocation3 + $0x4e0] sm:$0xff] }
  0x8d   :  { %1148 = vmatmul.mubr.bf16.gmra.mrb[44].mxu1 %v326_v20  ;;  %v272_v20 = vpack.c.bf16 %v112_v17, %v104_v16  ;;  %v281_v23 = vpack.c.bf16 %v129_v19, %v121_v18  ;;  %v312_v16 = vpack.c.bf16 %v192_v13, %v184_v12  ;;  %v186_v17 = vld [vmem:[#allocation3 + $0x4b0] sm:$0xff] }
  0x8e   :  { %1155 = vmatprep.mubr.bf16.mxu1 %v335_v21  ;;  %v106_v21 = vld [vmem:[#allocation3 + $0x230] sm:$0xff] }
  0x8f   :  { %v274_v26 = vpack.c.bf16 %v114_v22, %v106_v21  ;;  %v194_v18 = vld [vmem:[#allocation3 + $0x4f0] sm:$0xff]  ;;  %v211_v21 = vld [vmem:[#allocation3 + $0x578] sm:$0xff] }
  0x90   :  { %v314_v22 = vpack.c.bf16 %v194_v18, %v186_v17 }
  0x93   :  { %1020 = vmatmul.mubr.bf16.gmra.mrb[48].mxu0 %v332_v25  ;;  %v131_v25 = vld [vmem:[#allocation3 + $0x2f8] sm:$0xff] }
  0x94   :  { %1195 = vmatprep.mubr.bf16.mxu0 %v241_v27  ;;  %v283_v27 = vpack.c.bf16 %v131_v25, %v123_v24  ;;  %v200_v24 = vld [vmem:[#allocation3 + $0x520] sm:$0xff] }
  0x95   :  { %1156 = vmatmul.mubr.bf16.gmra.mrb[48].mxu1 %v334_v30  ;;  %v137_v30 = vld [vmem:[#allocation3 + $0x328] sm:$0xff]  ;;  %v208_v25 = vld [vmem:[#allocation3 + $0x560] sm:$0xff] }
  0x96   :  { %1840 = vmatprep.mubr.msk.bf16.mxu1 %vm847_vm1, %v243_v31  ;;  %v145_v31 = vld [vmem:[#allocation3 + $0x368] sm:$0xff]  ;;  %v320_v28 = vpack.c.bf16 %v208_v25, %v200_v24 }
  0x97   :  { %v289_v35 = vpack.c.bf16 %v145_v31, %v137_v30  ;;  %v210_v30 = vld [vmem:[#allocation3 + $0x570] sm:$0xff] }
  0x98   :  { %v322_v34 = vpack.c.bf16 %v210_v30, %v202_v29 }
  0x9b   :  { %1196 = vmatmul.mubr.bf16.vlgmr.msra.gmra.mrb[52].mxu0 %v240_v36  ;;  %v139_v36 = vld [vmem:[#allocation3 + $0x338] sm:$0xff] }
  0x9c   :  { %1203 = vmatprep.mubr.bf16.mxu0 %v249_v39  ;;  %v291_v39 = vpack.c.bf16 %v147_v37, %v139_v36  ;;  %v216_v36 = vld [vmem:[#allocation3 + $0x5a0] sm:$0xff] }
  0x9d   :  { %1332 = vmatmul.mubr.bf16.vlgmr.msra.gmra.mrb[52].mxu1 %v242_v42  ;;  %v153_v42 = vld [vmem:[#allocation3 + $0x3a8] sm:$0xff]  ;;  %v224_v37 = vld [vmem:[#allocation3 + $0x5e0] sm:$0xff] }
  0x9e   :  { %1841 = vmatprep.mubr.msk.bf16.mxu1 %vm847_vm1, %v251_v44  ;;  %v161_v44 = vld [vmem:[#allocation3 + $0x3e8] sm:$0xff] }
  0x9f   :  { %v297_v48 = vpack.c.bf16 %v161_v44, %v153_v42  ;;  %v235_v44 = vld [vmem:[#allocation3 + $0x638] sm:$0xff] }
  0xa0   :  { %v339_v46 = vpack.c.bf16 %v235_v44, %v235_v44 }
  0xa3   :  { %1204 = vmatmul.mubr.bf16.gmra.mrb[56].mxu0 %v248_v49  ;;  %v155_v49 = vld [vmem:[#allocation3 + $0x3b8] sm:$0xff] }
  0xa4   :  { %1211 = vmatprep.mubr.bf16.mxu0 %v257_v52  ;;  %v299_v52 = vpack.c.bf16 %v163_v50, %v155_v49  ;;  %v234_v49 = vld [vmem:[#allocation3 + $0x630] sm:$0xff] }
  0xa5   :  { %1340 = vmatmul.mubr.bf16.gmra.mrb[56].mxu1 %v250_v55  ;;  %v169_v55 = vld [vmem:[#allocation3 + $0x428] sm:$0xff]  ;;  %v338_v50 = vpack.c.bf16 %v234_v49, %v234_v49 }
  0xa6   :  { %1842 = vmatprep.mubr.msk.bf16.mxu1 %vm847_vm1, %v259_v56  ;;  %v177_v56 = vld [vmem:[#allocation3 + $0x468] sm:$0xff] }
  0xa7   :  { %v305_v60 = vpack.c.bf16 %v177_v56, %v169_v55 }
  0xab   :  { %1212 = vmatmul.mubr.bf16.gmra.mrb[60].mxu0 %v256_v61  ;;  %v171_v61 = vld [vmem:[#allocation3 + $0x438] sm:$0xff] }
  0xac   :  { %1219 = vmatprep.mubr.bf16.mxu0 %v265_v43  ;;  %v307_v43 = vpack.c.bf16 %v179_v62, %v171_v61 }
  0xad   :  { %1348 = vmatmul.mubr.bf16.gmra.mrb[60].mxu1 %v258_v2  ;;  %v185_v2 = vld [vmem:[#allocation3 + $0x4a8] sm:$0xff] }
  0xae   :  { %1843 = vmatprep.mubr.msk.bf16.mxu1 %vm847_vm1, %v267_v3  ;;  %v193_v3 = vld [vmem:[#allocation3 + $0x4e8] sm:$0xff] }
  0xaf   :  { %v313_v7 = vpack.c.bf16 %v193_v3, %v185_v2 }
  0xb3   :  { %1220 = vmatmul.mubr.bf16.gmra.mrb[64].mxu0 %v264_v8  ;;  %v187_v8 = vld [vmem:[#allocation3 + $0x4b8] sm:$0xff] }
  0xb4   :  { %1227 = vmatprep.mubr.bf16.mxu0 %v273_v11  ;;  %v315_v11 = vpack.c.bf16 %v195_v9, %v187_v8 }
  0xb5   :  { %1356 = vmatmul.mubr.bf16.gmra.mrb[64].mxu1 %v266_v14  ;;  %v201_v14 = vld [vmem:[#allocation3 + $0x528] sm:$0xff] }
  0xb6   :  { %1844 = vmatprep.mubr.msk.bf16.mxu1 %vm847_vm1, %v275_v15  ;;  %v209_v15 = vld [vmem:[#allocation3 + $0x568] sm:$0xff] }
  0xb7   :  { %v321_v19 = vpack.c.bf16 %v209_v15, %v201_v14 }
  0xbb   :  { %1228 = vmatmul.mubr.bf16.gmra.mrb[68].mxu0 %v272_v20  ;;  %v203_v20 = vld [vmem:[#allocation3 + $0x538] sm:$0xff] }
  0xbc   :  { %1235 = vmatprep.mubr.bf16.mxu0 %v281_v23  ;;  %v323_v23 = vpack.c.bf16 %v211_v21, %v203_v20 }
  0xbd   :  { %1364 = vmatmul.mubr.bf16.gmra.mrb[68].mxu1 %v274_v26  ;;  %v217_v26 = vld [vmem:[#allocation3 + $0x5a8] sm:$0xff] }
  0xbe   :  { %1845 = vmatprep.mubr.msk.bf16.mxu1 %vm847_vm1, %v283_v27  ;;  %v225_v27 = vld [vmem:[#allocation3 + $0x5e8] sm:$0xff] }
  0xbf   :  { %v329_v31 = vpack.c.bf16 %v225_v27, %v217_v26 }
  0xc3   :  { %1236 = vmatmul.mubr.bf16.gmra.mrb[72].mxu0 %v280_v32  ;;  %v219_v32 = vld [vmem:[#allocation3 + $0x5b8] sm:$0xff] }
  0xc4   :  { %1243 = vmatprep.mubr.bf16.mxu0 %v289_v35  ;;  %v331_v35 = vpack.c.bf16 %v227_v33, %v219_v32 }
  0xc5   :  { %1372 = vmatmul.mubr.bf16.gmra.mrb[72].mxu1 %v282_v38  ;;  %v233_v38 = vld [vmem:[#allocation3 + $0x628] sm:$0xff] }
  0xc6   :  { %1846 = vmatprep.mubr.msk.bf16.mxu1 %vm847_vm1, %v291_v39  ;;  %v328_v39 = vpack.c.bf16 %v224_v37, %v216_v36  ;;  %v337_v42 = vpack.c.bf16 %v233_v38, %v233_v38 }
  0xcb   :  { %1244 = vmatmul.mubr.bf16.gmra.mrb[76].mxu0 %v288_v45  ;;  %v330_v45 = vpack.c.bf16 %v226_v41, %v218_v40 }
  0xcc   :  { %1251 = vmatprep.mubr.bf16.mxu0 %v297_v48  ;;  %v336_v48 = vpack.c.bf16 %v232_v47, %v232_v47 }
  0xcd   :  { %1380 = vmatmul.mubr.bf16.gmra.mrb[76].mxu1 %v290_v51 }
  0xce   :  { %1847 = vmatprep.mubr.msk.bf16.mxu1 %vm847_vm1, %v299_v52  ;;  %v2618_v52 = vld [vmem:[%s2907_s2] ss:$0 sm:$0xff] }
  0xd3   :  { %1252 = vmatmul.mubr.bf16.gmra.mrb[80].mxu0 %v296_v57 }
  0xd4   :  { %1259 = vmatprep.mubr.bf16.mxu0 %v305_v60 }
  0xd5   :  { %1388 = vmatmul.mubr.bf16.gmra.mrb[80].mxu1 %v298_v63 }
  0xd6   :  { %1848 = vmatprep.mubr.msk.bf16.mxu1 %vm847_vm1, %v307_v43 }
  0xdb   :  { %1260 = vmatmul.mubr.bf16.gmra.mrb[84].mxu0 %v304_v4 }
  0xdc   :  { %1267 = vmatprep.mubr.bf16.mxu0 %v313_v7 }
  0xdd   :  { %1396 = vmatmul.mubr.bf16.gmra.mrb[84].mxu1 %v306_v10 }
  0xde   :  { %1849 = vmatprep.mubr.msk.bf16.mxu1 %vm847_vm1, %v315_v11 }
  0xe3   :  { %1268 = vmatmul.mubr.bf16.gmra.mrb[88].mxu0 %v312_v16 }
  0xe4   :  { %1275 = vmatprep.mubr.bf16.mxu0 %v321_v19 }
  0xe5   :  { %1404 = vmatmul.mubr.bf16.gmra.mrb[88].mxu1 %v314_v22 }
  0xe6   :  { %1850 = vmatprep.mubr.msk.bf16.mxu1 %vm847_vm1, %v323_v23 }
  0xeb   :  { %1276 = vmatmul.mubr.bf16.gmra.mrb[92].mxu0 %v320_v28 }
  0xec   :  { %1283 = vmatprep.mubr.bf16.mxu0 %v329_v31 }
  0xed   :  { %1412 = vmatmul.mubr.bf16.gmra.mrb[92].mxu1 %v322_v34 }
  0xee   :  { %1851 = vmatprep.mubr.msk.bf16.mxu1 %vm847_vm1, %v331_v35 }
  0xf3   :  { %1284 = vmatmul.mubr.bf16.gmra.mrb[96].mxu0 %v328_v39 }
  0xf4   :  { %1291 = vmatprep.mubr.bf16.mxu0 %v337_v42 }
  0xf5   :  { %1420 = vmatmul.mubr.bf16.gmra.mrb[96].mxu1 %v330_v45 }
  0xf6   :  { %1852 = vmatprep.mubr.msk.bf16.mxu1 %vm847_vm1, %v339_v46 }
  0xfb   :  { %1292 = vmatmul.mubr.bf16.gmra.mrb[100].mxu0 %v336_v48 }
  0xfd   :  { %1428 = vmatmul.mubr.bf16.gmra.mrb[100].mxu1 %v338_v50 }
 0x106   :  { %v1895_v51 = vpop.f32.mrb[0].mxu0 }
 0x107   :  { %v1896_v53 = vpop.f32.mrb[1].mxu0 }
 0x108   :  { %v1897_v54 = vadd.f32 %v1896_v53, %v1895_v51  ;;  %v1898_v55 = vpop.f32.mrb[2].mxu0  ;;  %v1989_v56 = vpop.f32.mrb[0].mxu1 }
 0x109   :  { %v1899_v57 = vpop.f32.mrb[3].mxu0  ;;  %v1990_v60 = vpop.f32.mrb[1].mxu1 }
 0x10a   :  { %v926_v58 = vadd.f32 %v1897_v54, %v2618_v52  ;;  %v1900_v59 = vadd.f32 %v1899_v57, %v1898_v55  ;;  %v1991_v61 = vadd.f32 %v1990_v60, %v1989_v56  ;;  %v1992_v62 = vpop.f32.mrb[2].mxu1 }
 0x10b   :  { %v1993_v43 = vpop.f32.mrb[3].mxu1 }
 0x10c   :  { %v929_v63 = vadd.f32 %v1900_v59, %v2618_v52  ;;  %v2622_v0 = vadd.f32 %v1991_v61, %v926_v58  ;;  %v1994_v1 = vadd.f32 %v1993_v43, %v1992_v62 }
 0x10e   :  { %v1901_v2 = vpop.f32.mrb[4].mxu0  ;;  %v2624_v3 = vadd.f32 %v1994_v1, %v929_v63 }
 0x10f   :  { %v1902_v4 = vpop.f32.mrb[5].mxu0 }
 0x110   :  { %v1903_v5 = vadd.f32 %v1902_v4, %v1901_v2  ;;  %v1904_v6 = vpop.f32.mrb[6].mxu0  ;;  %v1995_v7 = vpop.f32.mrb[4].mxu1 }
 0x111   :  { %v1905_v8 = vpop.f32.mrb[7].mxu0  ;;  %v1996_v11 = vpop.f32.mrb[5].mxu1 }
 0x112   :  { %v934_v9 = vadd.f32 %v1903_v5, %v2618_v52  ;;  %v1906_v10 = vadd.f32 %v1905_v8, %v1904_v6  ;;  %v1997_v12 = vadd.f32 %v1996_v11, %v1995_v7  ;;  %v1998_v13 = vpop.f32.mrb[6].mxu1 }
 0x113   :  { %v1999_v15 = vpop.f32.mrb[7].mxu1 }
 0x114   :  { %v937_v14 = vadd.f32 %v1906_v10, %v2618_v52  ;;  %v2628_v16 = vadd.f32 %v1997_v12, %v934_v9  ;;  %v2000_v17 = vadd.f32 %v1999_v15, %v1998_v13 }
 0x116   :  { %v1907_v18 = vpop.f32.mrb[8].mxu0  ;;  %v2630_v19 = vadd.f32 %v2000_v17, %v937_v14 }
 0x117   :  { %v1908_v20 = vpop.f32.mrb[9].mxu0 }
 0x118   :  { %v1909_v21 = vadd.f32 %v1908_v20, %v1907_v18  ;;  %v1910_v22 = vpop.f32.mrb[10].mxu0  ;;  %v2001_v23 = vpop.f32.mrb[8].mxu1 }
 0x119   :  { %v1911_v24 = vpop.f32.mrb[11].mxu0  ;;  %v2002_v27 = vpop.f32.mrb[9].mxu1 }
 0x11a   :  { %v942_v25 = vadd.f32 %v1909_v21, %v2618_v52  ;;  %v1912_v26 = vadd.f32 %v1911_v24, %v1910_v22  ;;  %v2003_v28 = vadd.f32 %v2002_v27, %v2001_v23  ;;  %v2004_v29 = vpop.f32.mrb[10].mxu1 }
 0x11b   :  { %v2005_v31 = vpop.f32.mrb[11].mxu1 }
 0x11c   :  { %v945_v30 = vadd.f32 %v1912_v26, %v2618_v52  ;;  %v2634_v32 = vadd.f32 %v2003_v28, %v942_v25  ;;  %v2006_v33 = vadd.f32 %v2005_v31, %v2004_v29 }
 0x11e   :  { %v1913_v34 = vpop.f32.mrb[12].mxu0  ;;  %v2636_v35 = vadd.f32 %v2006_v33, %v945_v30 }
 0x11f   :  { %v1914_v36 = vpop.f32.mrb[13].mxu0 }
 0x120   :  { %v1915_v37 = vadd.f32 %v1914_v36, %v1913_v34  ;;  %v1916_v38 = vpop.f32.mrb[14].mxu0  ;;  %v2007_v39 = vpop.f32.mrb[12].mxu1 }
 0x121   :  { %v1917_v40 = vpop.f32.mrb[15].mxu0  ;;  %v2008_v44 = vpop.f32.mrb[13].mxu1 }
 0x122   :  { %v950_v41 = vadd.f32 %v1915_v37, %v2618_v52  ;;  %v1918_v42 = vadd.f32 %v1917_v40, %v1916_v38  ;;  %v2009_v45 = vadd.f32 %v2008_v44, %v2007_v39  ;;  %v2010_v46 = vpop.f32.mrb[14].mxu1 }
 0x123   :  { %v2011_v48 = vpop.f32.mrb[15].mxu1 }
 0x124   :  { %v953_v47 = vadd.f32 %v1918_v42, %v2618_v52  ;;  %v2640_v49 = vadd.f32 %v2009_v45, %v950_v41  ;;  %v2012_v50 = vadd.f32 %v2011_v48, %v2010_v46 }
 0x126   :  { %v1919_v51 = vpop.f32.mrb[16].mxu0  ;;  %v2642_v53 = vadd.f32 %v2012_v50, %v953_v47 }
 0x127   :  { %v1920_v54 = vpop.f32.mrb[17].mxu0 }
 0x128   :  { %v1921_v55 = vadd.f32 %v1920_v54, %v1919_v51  ;;  %v1922_v56 = vpop.f32.mrb[18].mxu0  ;;  %v2013_v57 = vpop.f32.mrb[16].mxu1 }
 0x129   :  { %v1923_v58 = vpop.f32.mrb[19].mxu0  ;;  %v2014_v61 = vpop.f32.mrb[17].mxu1 }
 0x12a   :  { %v958_v59 = vadd.f32 %v1921_v55, %v2618_v52  ;;  %v1924_v60 = vadd.f32 %v1923_v58, %v1922_v56  ;;  %v2015_v62 = vadd.f32 %v2014_v61, %v2013_v57  ;;  %v2016_v63 = vpop.f32.mrb[18].mxu1 }
 0x12b   :  { %v2017_v1 = vpop.f32.mrb[19].mxu1 }
 0x12c   :  { %v961_v43 = vadd.f32 %v1924_v60, %v2618_v52  ;;  %v2646_v2 = vadd.f32 %v2015_v62, %v958_v59  ;;  %v2018_v4 = vadd.f32 %v2017_v1, %v2016_v63 }
 0x12e   :  { %v1925_v5 = vpop.f32.mrb[20].mxu0  ;;  %v2648_v6 = vadd.f32 %v2018_v4, %v961_v43 }
 0x12f   :  { %v1926_v7 = vpop.f32.mrb[21].mxu0 }
 0x130   :  { %v1927_v8 = vadd.f32 %v1926_v7, %v1925_v5  ;;  %v1928_v9 = vpop.f32.mrb[22].mxu0  ;;  %v2019_v10 = vpop.f32.mrb[20].mxu1 }
 0x131   :  { %v1929_v11 = vpop.f32.mrb[23].mxu0  ;;  %v2020_v14 = vpop.f32.mrb[21].mxu1 }
 0x132   :  { %v966_v12 = vadd.f32 %v1927_v8, %v2618_v52  ;;  %v1930_v13 = vadd.f32 %v1929_v11, %v1928_v9  ;;  %v2021_v15 = vadd.f32 %v2020_v14, %v2019_v10  ;;  %v2022_v17 = vpop.f32.mrb[22].mxu1 }
 0x133   :  { %v2023_v20 = vpop.f32.mrb[23].mxu1 }
 0x134   :  { %v969_v18 = vadd.f32 %v1930_v13, %v2618_v52  ;;  %v2652_v21 = vadd.f32 %v2021_v15, %v966_v12  ;;  %v2024_v22 = vadd.f32 %v2023_v20, %v2022_v17 }
 0x136   :  { %v1931_v23 = vpop.f32.mrb[24].mxu0  ;;  %v2654_v24 = vadd.f32 %v2024_v22, %v969_v18 }
 0x137   :  { %v1932_v25 = vpop.f32.mrb[25].mxu0 }
 0x138   :  { %v1933_v26 = vadd.f32 %v1932_v25, %v1931_v23  ;;  %v1934_v27 = vpop.f32.mrb[26].mxu0  ;;  %v2025_v28 = vpop.f32.mrb[24].mxu1 }
 0x139   :  { %v1935_v29 = vpop.f32.mrb[27].mxu0  ;;  %v2026_v33 = vpop.f32.mrb[25].mxu1 }
 0x13a   :  { %v974_v30 = vadd.f32 %v1933_v26, %v2618_v52  ;;  %v1936_v31 = vadd.f32 %v1935_v29, %v1934_v27  ;;  %v2027_v34 = vadd.f32 %v2026_v33, %v2025_v28  ;;  %v2028_v36 = vpop.f32.mrb[26].mxu1 }
 0x13b   :  { %v2029_v38 = vpop.f32.mrb[27].mxu1 }
 0x13c   :  { %v977_v37 = vadd.f32 %v1936_v31, %v2618_v52  ;;  %v2658_v39 = vadd.f32 %v2027_v34, %v974_v30  ;;  %v2030_v40 = vadd.f32 %v2029_v38, %v2028_v36 }
 0x13e   :  { %v1937_v41 = vpop.f32.mrb[28].mxu0  ;;  %v2660_v42 = vadd.f32 %v2030_v40, %v977_v37 }
 0x13f   :  { %v1938_v44 = vpop.f32.mrb[29].mxu0 }
 0x140   :  { %v1939_v45 = vadd.f32 %v1938_v44, %v1937_v41  ;;  %v1940_v46 = vpop.f32.mrb[30].mxu0  ;;  %v2031_v47 = vpop.f32.mrb[28].mxu1 }
 0x141   :  { %v1941_v48 = vpop.f32.mrb[31].mxu0  ;;  %v2032_v54 = vpop.f32.mrb[29].mxu1 }
 0x142   :  { %v982_v50 = vadd.f32 %v1939_v45, %v2618_v52  ;;  %v1942_v51 = vadd.f32 %v1941_v48, %v1940_v46  ;;  %v2033_v55 = vadd.f32 %v2032_v54, %v2031_v47  ;;  %v2034_v56 = vpop.f32.mrb[30].mxu1 }
 0x143   :  { %v2035_v58 = vpop.f32.mrb[31].mxu1 }
 0x144   :  { %v985_v57 = vadd.f32 %v1942_v51, %v2618_v52  ;;  %v2664_v59 = vadd.f32 %v2033_v55, %v982_v50  ;;  %v2036_v60 = vadd.f32 %v2035_v58, %v2034_v56 }
 0x146   :  { %v1943_v61 = vpop.f32.mrb[32].mxu0  ;;  %v2666_v62 = vadd.f32 %v2036_v60, %v985_v57 }
 0x147   :  { %v1944_v63 = vpop.f32.mrb[33].mxu0 }
 0x148   :  { %v1945_v43 = vadd.f32 %v1944_v63, %v1943_v61  ;;  %v1946_v1 = vpop.f32.mrb[34].mxu0  ;;  %v2037_v4 = vpop.f32.mrb[32].mxu1 }
 0x149   :  { %v1947_v5 = vpop.f32.mrb[35].mxu0  ;;  %v2038_v9 = vpop.f32.mrb[33].mxu1 }
 0x14a   :  { %v990_v7 = vadd.f32 %v1945_v43, %v2618_v52  ;;  %v1948_v8 = vadd.f32 %v1947_v5, %v1946_v1  ;;  %v2039_v10 = vadd.f32 %v2038_v9, %v2037_v4  ;;  %v2040_v11 = vpop.f32.mrb[34].mxu1 }
 0x14b   :  { %v2041_v13 = vpop.f32.mrb[35].mxu1 }
 0x14c   :  { %v993_v12 = vadd.f32 %v1948_v8, %v2618_v52  ;;  %v2670_v14 = vadd.f32 %v2039_v10, %v990_v7  ;;  %v2042_v15 = vadd.f32 %v2041_v13, %v2040_v11 }
 0x14e   :  { %v1949_v17 = vpop.f32.mrb[36].mxu0  ;;  %v2672_v18 = vadd.f32 %v2042_v15, %v993_v12 }
 0x14f   :  { %v1950_v20 = vpop.f32.mrb[37].mxu0 }
 0x150   :  { %v1951_v22 = vadd.f32 %v1950_v20, %v1949_v17  ;;  %v1952_v23 = vpop.f32.mrb[38].mxu0  ;;  %v2043_v25 = vpop.f32.mrb[36].mxu1 }
 0x151   :  { %v1953_v26 = vpop.f32.mrb[39].mxu0  ;;  %v2044_v29 = vpop.f32.mrb[37].mxu1 }
 0x152   :  { %v998_v27 = vadd.f32 %v1951_v22, %v2618_v52  ;;  %v1954_v28 = vadd.f32 %v1953_v26, %v1952_v23  ;;  %v2045_v30 = vadd.f32 %v2044_v29, %v2043_v25  ;;  %v2046_v31 = vpop.f32.mrb[38].mxu1 }
 0x153   :  { %v2047_v34 = vpop.f32.mrb[39].mxu1 }
 0x154   :  { %v1001_v33 = vadd.f32 %v1954_v28, %v2618_v52  ;;  %v2676_v36 = vadd.f32 %v2045_v30, %v998_v27  ;;  %v2048_v37 = vadd.f32 %v2047_v34, %v2046_v31 }
 0x156   :  { %v1955_v38 = vpop.f32.mrb[40].mxu0  ;;  %v2678_v40 = vadd.f32 %v2048_v37, %v1001_v33 }
 0x157   :  { %v1956_v41 = vpop.f32.mrb[41].mxu0 }
 0x158   :  { %v1957_v44 = vadd.f32 %v1956_v41, %v1955_v38  ;;  %v1958_v45 = vpop.f32.mrb[42].mxu0  ;;  %v2049_v46 = vpop.f32.mrb[40].mxu1 }
 0x159   :  { %v1959_v47 = vpop.f32.mrb[43].mxu0  ;;  %v2050_v51 = vpop.f32.mrb[41].mxu1 }
 0x15a   :  { %v1006_v48 = vadd.f32 %v1957_v44, %v2618_v52  ;;  %v1960_v50 = vadd.f32 %v1959_v47, %v1958_v45  ;;  %v2051_v54 = vadd.f32 %v2050_v51, %v2049_v46  ;;  %v2052_v55 = vpop.f32.mrb[42].mxu1 }
 0x15b   :  { %v2053_v57 = vpop.f32.mrb[43].mxu1 }
 0x15c   :  { %v1009_v56 = vadd.f32 %v1960_v50, %v2618_v52  ;;  %v2682_v58 = vadd.f32 %v2051_v54, %v1006_v48  ;;  %v2054_v60 = vadd.f32 %v2053_v57, %v2052_v55 }
 0x15e   :  { %v1961_v61 = vpop.f32.mrb[44].mxu0  ;;  %v2684_v63 = vadd.f32 %v2054_v60, %v1009_v56  ;;  %v2700_v60 = vld [vmem:[%s2908_s3] ss:$0 sm:$0xff] }
 0x15f   :  { %v1962_v43 = vpop.f32.mrb[45].mxu0 }
 0x160   :  { %v1963_v1 = vadd.f32 %v1962_v43, %v1961_v61  ;;  %v1964_v4 = vpop.f32.mrb[46].mxu0  ;;  %v2055_v5 = vpop.f32.mrb[44].mxu1 }
 0x161   :  { %v1965_v7 = vpop.f32.mrb[47].mxu0  ;;  %v2056_v10 = vpop.f32.mrb[45].mxu1 }
 0x162   :  { %v1014_v8 = vadd.f32 %v1963_v1, %v2618_v52  ;;  %v1966_v9 = vadd.f32 %v1965_v7, %v1964_v4  ;;  %v2057_v11 = vadd.f32 %v2056_v10, %v2055_v5  ;;  %v2058_v12 = vpop.f32.mrb[46].mxu1 }
 0x163   :  { %v2059_v15 = vpop.f32.mrb[47].mxu1 }
 0x164   :  { %v1017_v13 = vadd.f32 %v1966_v9, %v2618_v52  ;;  %v2688_v17 = vadd.f32 %v2057_v11, %v1014_v8  ;;  %v2060_v20 = vadd.f32 %v2059_v15, %v2058_v12 }
 0x166   :  { %v1967_v22 = vpop.f32.mrb[48].mxu0  ;;  %v2690_v23 = vadd.f32 %v2060_v20, %v1017_v13 }
 0x167   :  { %v1968_v25 = vpop.f32.mrb[49].mxu0 }
 0x168   :  { %v1969_v26 = vadd.f32 %v1968_v25, %v1967_v22  ;;  %v1970_v27 = vpop.f32.mrb[50].mxu0  ;;  %v2061_v28 = vpop.f32.mrb[48].mxu1 }
 0x169   :  { %v1971_v29 = vpop.f32.mrb[51].mxu0  ;;  %v2062_v31 = vpop.f32.mrb[49].mxu1 }
 0x16a   :  { %v1022_v30 = vadd.f32 %v1969_v26, %v2618_v52  ;;  %v2063_v33 = vadd.f32 %v2062_v31, %v2061_v28  ;;  %v2064_v34 = vpop.f32.mrb[50].mxu1 }
 0x16b   :  { %v2065_v37 = vpop.f32.mrb[51].mxu1 }
 0x16c   :  { %v2693_v38 = vadd.f32 %v2063_v33, %v1022_v30 }
 0x16e   :  { %v2083_v41 = vpop.f32.mrb[52].mxu0 }
 0x16f   :  { %v2084_v44 = vpop.f32.mrb[53].mxu0 }
 0x170   :  { %v2085_v45 = vadd.f32 %v2084_v44, %v2083_v41  ;;  %v2086_v46 = vpop.f32.mrb[54].mxu0  ;;  %v1333_v48 = vpop.f32.mrb[52].mxu1 }
 0x171   :  { %v2087_v47 = vpop.f32.mrb[55].mxu0  ;;  %v1335_v54 = vpop.f32.mrb[53].mxu1 }
 0x172   :  { %v2088_v50 = vadd.f32 %v2087_v47, %v2086_v46  ;;  %v1198_v51 = vadd.f32 %v2085_v45, %v2622_v0  ;;  %v1336_v55 = vpop.f32.mrb[54].mxu1 }
 0x173   :  { %v1338_v57 = vpop.f32.mrb[55].mxu1 }
 0x174   :  { %v1334_v56 = vadd.f32 %v1333_v48, %v1198_v51  ;;  %v1201_v52 = vadd.f32 %v2088_v50, %v2624_v3 }
 0x176   :  { %v1435_v61 = vmax.f32 %v1334_v56, 0.0  ;;  %v1337_v43 = vadd.f32 %v1336_v55, %v1201_v52  ;;  %v2089_v1 = vpop.f32.mrb[56].mxu0 }
 0x177   :  { %v2090_v4 = vpop.f32.mrb[57].mxu0 }
 0x178   :  { %v1436_v5 = vmax.f32 %v1337_v43, 0.0  ;;  %v2091_v7 = vadd.f32 %v2090_v4, %v2089_v1  ;;  %v2092_v8 = vpop.f32.mrb[58].mxu0  ;;  %v1467_v0 = vmul.f32 %v2700_v60, %v1435_v61  ;;  %v1341_v10 = vpop.f32.mrb[56].mxu1 }
 0x179   :  { %v2093_v9 = vpop.f32.mrb[59].mxu0  ;;  %v1343_v12 = vpop.f32.mrb[57].mxu1 }
 0x17a   :  { %v2094_v11 = vadd.f32 %v2093_v9, %v2092_v8  ;;  %v1206_v3 = vadd.f32 %v2091_v7, %v2628_v16  ;;  %v1493_v13 = vsel %vm1492_vm2, %v1467_v0, 0.0  ;;  %v1468_v15 = vmul.f32 %v2700_v60, %v1436_v5  ;;  %v1344_v20 = vpop.f32.mrb[58].mxu1 }
 0x17b   :  { %1494 = vadd.xlane.f32.xlu0 %v1493_v13  ;;  %v1346_v26 = vpop.f32.mrb[59].mxu1 }
 0x17c   :  { %v1342_v22 = vadd.f32 %v1341_v10, %v1206_v3  ;;  %v1209_v25 = vadd.f32 %v2094_v11, %v2630_v19  ;;  %v1496_v30 = vsel %vm1492_vm2, %v1468_v15, 0.0 }
 0x17e   :  { %v1437_v27 = vmax.f32 %v1342_v22, 0.0  ;;  %v1345_v28 = vadd.f32 %v1344_v20, %v1209_v25  ;;  %v2095_v29 = vpop.f32.mrb[60].mxu0 }
 0x17f   :  { %v2096_v31 = vpop.f32.mrb[61].mxu0  ;;  %1497 = vadd.xlane.f32.xlu0 %v1496_v30 }
 0x180   :  { %v1438_v33 = vmax.f32 %v1345_v28, 0.0  ;;  %v2097_v16 = vadd.f32 %v2096_v31, %v2095_v29  ;;  %v2098_v34 = vpop.f32.mrb[62].mxu0  ;;  %v1469_v37 = vmul.f32 %v2700_v60, %v1437_v27  ;;  %v1349_v44 = vpop.f32.mrb[60].mxu1 }
 0x181   :  { %v2099_v41 = vpop.f32.mrb[63].mxu0  ;;  %v1351_v47 = vpop.f32.mrb[61].mxu1 }
 0x182   :  { %v2100_v45 = vadd.f32 %v2099_v41, %v2098_v34  ;;  %v1214_v46 = vadd.f32 %v2097_v16, %v2634_v32  ;;  %v1499_v19 = vsel %vm1492_vm2, %v1469_v37, 0.0  ;;  %v1470_v48 = vmul.f32 %v2700_v60, %v1438_v33  ;;  %v1352_v50 = vpop.f32.mrb[62].mxu1 }
 0x183   :  { %1500 = vadd.xlane.f32.xlu1 %v1499_v19  ;;  %v1354_v55 = vpop.f32.mrb[63].mxu1 }
 0x184   :  { %v1350_v51 = vadd.f32 %v1349_v44, %v1214_v46  ;;  %v1217_v54 = vadd.f32 %v2100_v45, %v2636_v35  ;;  %v1502_v61 = vsel %vm1492_vm2, %v1470_v48, 0.0 }
 0x186   :  { %v1439_v56 = vmax.f32 %v1350_v51, 0.0  ;;  %v1353_v52 = vadd.f32 %v1352_v50, %v1217_v54  ;;  %v2101_v57 = vpop.f32.mrb[64].mxu0 }
 0x187   :  { %v2102_v43 = vpop.f32.mrb[65].mxu0  ;;  %1503 = vadd.xlane.f32.xlu1 %v1502_v61 }
 0x188   :  { %v1440_v1 = vmax.f32 %v1353_v52, 0.0  ;;  %v2103_v32 = vadd.f32 %v2102_v43, %v2101_v57  ;;  %v2104_v4 = vpop.f32.mrb[66].mxu0  ;;  %v1471_v5 = vmul.f32 %v2700_v60, %v1439_v56  ;;  %v1357_v8 = vpop.f32.mrb[64].mxu1 }
 0x189   :  { %v2105_v7 = vpop.f32.mrb[67].mxu0  ;;  %v1359_v10 = vpop.f32.mrb[65].mxu1 }
 0x18a   :  { %v2106_v0 = vadd.f32 %v2105_v7, %v2104_v4  ;;  %v1222_v9 = vadd.f32 %v2103_v32, %v2640_v49  ;;  %v1505_v35 = vsel %vm1492_vm2, %v1471_v5, 0.0  ;;  %v1472_v11 = vmul.f32 %v2700_v60, %v1440_v1  ;;  %v1360_v3 = vpop.f32.mrb[66].mxu1 }
 0x18b   :  { %1506 = vadd.xlane.f32.xlu0 %v1505_v35  ;;  %v1362_v15 = vpop.f32.mrb[67].mxu1 }
 0x18c   :  { %v1358_v12 = vadd.f32 %v1357_v8, %v1222_v9  ;;  %v1225_v13 = vadd.f32 %v2106_v0, %v2642_v53  ;;  %v1508_v20 = vsel %vm1492_vm2, %v1472_v11, 0.0 }
 0x18d   :  { %1509 = vadd.xlane.f32.xlu1 %v1508_v20 }
 0x18e   :  { %v1441_v22 = vmax.f32 %v1358_v12, 0.0  ;;  %v1361_v25 = vadd.f32 %v1360_v3, %v1225_v13  ;;  %v2107_v26 = vpop.f32.mrb[68].mxu0 }
 0x18f   :  { %v2108_v27 = vpop.f32.mrb[69].mxu0 }
 0x190   :  { %v1442_v28 = vmax.f32 %v1361_v25, 0.0  ;;  %v2109_v49 = vadd.f32 %v2108_v27, %v2107_v26  ;;  %v2110_v29 = vpop.f32.mrb[70].mxu0  ;;  %v1473_v30 = vmul.f32 %v2700_v60, %v1441_v22  ;;  %v1365_v33 = vpop.f32.mrb[68].mxu1 }
 0x191   :  { %v2111_v31 = vpop.f32.mrb[71].mxu0  ;;  %v1367_v37 = vpop.f32.mrb[69].mxu1 }
 0x192   :  { %v2112_v16 = vadd.f32 %v2111_v31, %v2110_v29  ;;  %v1230_v34 = vadd.f32 %v2109_v49, %v2646_v2  ;;  %v1511_v53 = vsel %vm1492_vm2, %v1473_v30, 0.0  ;;  %v1474_v41 = vmul.f32 %v2700_v60, %v1442_v28  ;;  %v1368_v44 = vpop.f32.mrb[70].mxu1 }
 0x193   :  { %1512 = vadd.xlane.f32.xlu0 %v1511_v53  ;;  %v1370_v47 = vpop.f32.mrb[71].mxu1 }
 0x194   :  { %v1366_v45 = vadd.f32 %v1365_v33, %v1230_v34  ;;  %v1233_v46 = vadd.f32 %v2112_v16, %v2648_v6  ;;  %v1514_v19 = vsel %vm1492_vm2, %v1474_v41, 0.0 }
 0x195   :  { %1515 = vadd.xlane.f32.xlu1 %v1514_v19 }
 0x196   :  { %v1443_v48 = vmax.f32 %v1366_v45, 0.0  ;;  %v1369_v50 = vadd.f32 %v1368_v44, %v1233_v46  ;;  %v2113_v51 = vpop.f32.mrb[72].mxu0 }
 0x197   :  { %v2114_v54 = vpop.f32.mrb[73].mxu0 }
 0x198   :  { %v1444_v55 = vmax.f32 %v1369_v50, 0.0  ;;  %v2115_v2 = vadd.f32 %v2114_v54, %v2113_v51  ;;  %v2116_v56 = vpop.f32.mrb[74].mxu0  ;;  %v1475_v52 = vmul.f32 %v2700_v60, %v1443_v48  ;;  %v1373_v61 = vpop.f32.mrb[72].mxu1 }
 0x199   :  { %v2117_v57 = vpop.f32.mrb[75].mxu0  ;;  %v1375_v32 = vpop.f32.mrb[73].mxu1 }
 0x19a   :  { %v2118_v43 = vadd.f32 %v2117_v57, %v2116_v56  ;;  %v1238_v1 = vadd.f32 %v2115_v2, %v2652_v21  ;;  %v1517_v6 = vsel %vm1492_vm2, %v1475_v52, 0.0  ;;  %v1476_v4 = vmul.f32 %v2700_v60, %v1444_v55  ;;  %v1376_v5 = vpop.f32.mrb[74].mxu1 }
 0x19b   :  { %1518 = vadd.xlane.f32.xlu0 %v1517_v6  ;;  %v1378_v0 = vpop.f32.mrb[75].mxu1 }
 0x19c   :  { %v1374_v7 = vadd.f32 %v1373_v61, %v1238_v1  ;;  %v1241_v8 = vadd.f32 %v2118_v43, %v2654_v24  ;;  %v1520_v9 = vsel %vm1492_vm2, %v1476_v4, 0.0 }
 0x19d   :  { %1521 = vadd.xlane.f32.xlu1 %v1520_v9 }
 0x19e   :  { %v1445_v10 = vmax.f32 %v1374_v7, 0.0  ;;  %v1377_v35 = vadd.f32 %v1376_v5, %v1241_v8  ;;  %v2119_v11 = vpop.f32.mrb[76].mxu0 }
 0x19f   :  { %v2120_v3 = vpop.f32.mrb[77].mxu0 }
 0x1a0   :  { %v1446_v12 = vmax.f32 %v1377_v35, 0.0  ;;  %v2121_v21 = vadd.f32 %v2120_v3, %v2119_v11  ;;  %v2122_v13 = vpop.f32.mrb[78].mxu0  ;;  %v1477_v15 = vmul.f32 %v2700_v60, %v1445_v10  ;;  %v1381_v22 = vpop.f32.mrb[76].mxu1 }
 0x1a1   :  { %v2123_v20 = vpop.f32.mrb[79].mxu0  ;;  %v1383_v27 = vpop.f32.mrb[77].mxu1 }
 0x1a2   :  { %v2124_v25 = vadd.f32 %v2123_v20, %v2122_v13  ;;  %v1246_v26 = vadd.f32 %v2121_v21, %v2658_v39  ;;  %v1523_v24 = vsel %vm1492_vm2, %v1477_v15, 0.0  ;;  %v1478_v28 = vmul.f32 %v2700_v60, %v1446_v12  ;;  %v1384_v49 = vpop.f32.mrb[78].mxu1 }
 0x1a3   :  { %1524 = vadd.xlane.f32.xlu0 %v1523_v24  ;;  %v1386_v31 = vpop.f32.mrb[79].mxu1 }
 0x1a4   :  { %v1382_v29 = vadd.f32 %v1381_v22, %v1246_v26  ;;  %v1249_v30 = vadd.f32 %v2124_v25, %v2660_v42  ;;  %v1526_v33 = vsel %vm1492_vm2, %v1478_v28, 0.0 }
 0x1a5   :  { %1527 = vadd.xlane.f32.xlu1 %v1526_v33 }
 0x1a6   :  { %v1447_v16 = vmax.f32 %v1382_v29, 0.0  ;;  %v1385_v34 = vadd.f32 %v1384_v49, %v1249_v30  ;;  %v2125_v37 = vpop.f32.mrb[80].mxu0 }
 0x1a7   :  { %v2126_v53 = vpop.f32.mrb[81].mxu0 }
 0x1a8   :  { %v1448_v41 = vmax.f32 %v1385_v34, 0.0  ;;  %v2127_v39 = vadd.f32 %v2126_v53, %v2125_v37  ;;  %v2128_v44 = vpop.f32.mrb[82].mxu0  ;;  %v1479_v45 = vmul.f32 %v2700_v60, %v1447_v16  ;;  %v1389_v47 = vpop.f32.mrb[80].mxu1 }
 0x1a9   :  { %v2129_v46 = vpop.f32.mrb[83].mxu0  ;;  %v1391_v50 = vpop.f32.mrb[81].mxu1 }
 0x1aa   :  { %v2130_v19 = vadd.f32 %v2129_v46, %v2128_v44  ;;  %v1254_v48 = vadd.f32 %v2127_v39, %v2664_v59  ;;  %v1529_v42 = vsel %vm1492_vm2, %v1479_v45, 0.0  ;;  %v1480_v51 = vmul.f32 %v2700_v60, %v1448_v41  ;;  %v1392_v54 = vpop.f32.mrb[82].mxu1 }
 0x1ab   :  { %1530 = vadd.xlane.f32.xlu0 %v1529_v42  ;;  %v1394_v56 = vpop.f32.mrb[83].mxu1 }
 0x1ac   :  { %v1390_v55 = vadd.f32 %v1389_v47, %v1254_v48  ;;  %v1257_v2 = vadd.f32 %v2130_v19, %v2666_v62  ;;  %v1532_v52 = vsel %vm1492_vm2, %v1480_v51, 0.0 }
 0x1ad   :  { %1533 = vadd.xlane.f32.xlu1 %v1532_v52 }
 0x1ae   :  { %v1449_v57 = vmax.f32 %v1390_v55, 0.0  ;;  %v1393_v61 = vadd.f32 %v1392_v54, %v1257_v2  ;;  %v2131_v43 = vpop.f32.mrb[84].mxu0 }
 0x1af   :  { %v2132_v1 = vpop.f32.mrb[85].mxu0 }
 0x1b0   :  { %v1450_v32 = vmax.f32 %v1393_v61, 0.0  ;;  %v2133_v59 = vadd.f32 %v2132_v1, %v2131_v43  ;;  %v2134_v6 = vpop.f32.mrb[86].mxu0  ;;  %v1481_v4 = vmul.f32 %v2700_v60, %v1449_v57  ;;  %v1397_v7 = vpop.f32.mrb[84].mxu1 }
 0x1b1   :  { %v2135_v5 = vpop.f32.mrb[87].mxu0  ;;  %v1399_v9 = vpop.f32.mrb[85].mxu1 }
 0x1b2   :  { %v2136_v8 = vadd.f32 %v2135_v5, %v2134_v6  ;;  %v1262_v0 = vadd.f32 %v2133_v59, %v2670_v14  ;;  %v1535_v62 = vsel %vm1492_vm2, %v1481_v4, 0.0  ;;  %v1482_v10 = vmul.f32 %v2700_v60, %v1450_v32  ;;  %v1400_v35 = vpop.f32.mrb[86].mxu1 }
 0x1b3   :  { %1536 = vadd.xlane.f32.xlu0 %v1535_v62  ;;  %v1402_v12 = vpop.f32.mrb[87].mxu1 }
 0x1b4   :  { %v1398_v11 = vadd.f32 %v1397_v7, %v1262_v0  ;;  %v1265_v3 = vadd.f32 %v2136_v8, %v2672_v18  ;;  %v1538_v21 = vsel %vm1492_vm2, %v1482_v10, 0.0 }
 0x1b5   :  { %1539 = vadd.xlane.f32.xlu1 %v1538_v21 }
 0x1b6   :  { %v1451_v13 = vmax.f32 %v1398_v11, 0.0  ;;  %v1401_v15 = vadd.f32 %v1400_v35, %v1265_v3  ;;  %v2137_v20 = vpop.f32.mrb[88].mxu0 }
 0x1b7   :  { %v2138_v22 = vpop.f32.mrb[89].mxu0 }
 0x1b8   :  { %v1452_v25 = vmax.f32 %v1401_v15, 0.0  ;;  %v2139_v14 = vadd.f32 %v2138_v22, %v2137_v20  ;;  %v2140_v26 = vpop.f32.mrb[90].mxu0  ;;  %v1483_v27 = vmul.f32 %v2700_v60, %v1451_v13  ;;  %v1405_v28 = vpop.f32.mrb[88].mxu1 }
 0x1b9   :  { %v2141_v24 = vpop.f32.mrb[91].mxu0  ;;  %v1407_v30 = vpop.f32.mrb[89].mxu1 }
 0x1ba   :  { %v2142_v49 = vadd.f32 %v2141_v24, %v2140_v26  ;;  %v1270_v29 = vadd.f32 %v2139_v14, %v2676_v36  ;;  %v1541_v18 = vsel %vm1492_vm2, %v1483_v27, 0.0  ;;  %v1484_v31 = vmul.f32 %v2700_v60, %v1452_v25  ;;  %v1408_v33 = vpop.f32.mrb[90].mxu1 }
 0x1bb   :  { %1542 = vadd.xlane.f32.xlu0 %v1541_v18  ;;  %v1410_v37 = vpop.f32.mrb[91].mxu1 }
 0x1bc   :  { %v1406_v16 = vadd.f32 %v1405_v28, %v1270_v29  ;;  %v1273_v34 = vadd.f32 %v2142_v49, %v2678_v40  ;;  %v1544_v53 = vsel %vm1492_vm2, %v1484_v31, 0.0 }
 0x1bd   :  { %1545 = vadd.xlane.f32.xlu1 %v1544_v53 }
 0x1be   :  { %v1453_v41 = vmax.f32 %v1406_v16, 0.0  ;;  %v1409_v39 = vadd.f32 %v1408_v33, %v1273_v34  ;;  %v2143_v44 = vpop.f32.mrb[92].mxu0 }
 0x1bf   :  { %v2144_v45 = vpop.f32.mrb[93].mxu0 }
 0x1c0   :  { %v1454_v46 = vmax.f32 %v1409_v39, 0.0  ;;  %v2145_v36 = vadd.f32 %v2144_v45, %v2143_v44  ;;  %v2146_v47 = vpop.f32.mrb[94].mxu0  ;;  %v1485_v19 = vmul.f32 %v2700_v60, %v1453_v41  ;;  %v1413_v50 = vpop.f32.mrb[92].mxu1 }
 0x1c1   :  { %v2147_v48 = vpop.f32.mrb[95].mxu0  ;;  %v1415_v54 = vpop.f32.mrb[93].mxu1 }
 0x1c2   :  { %v2148_v42 = vadd.f32 %v2147_v48, %v2146_v47  ;;  %v1278_v51 = vadd.f32 %v2145_v36, %v2682_v58  ;;  %v1547_v40 = vsel %vm1492_vm2, %v1485_v19, 0.0  ;;  %v1486_v55 = vmul.f32 %v2700_v60, %v1454_v46  ;;  %v1416_v2 = vpop.f32.mrb[94].mxu1 }
 0x1c3   :  { %1548 = vadd.xlane.f32.xlu0 %v1547_v40  ;;  %v1418_v57 = vpop.f32.mrb[95].mxu1 }
 0x1c4   :  { %v1414_v56 = vadd.f32 %v1413_v50, %v1278_v51  ;;  %v1281_v52 = vadd.f32 %v2148_v42, %v2684_v63  ;;  %v1550_v61 = vsel %vm1492_vm2, %v1486_v55, 0.0 }
 0x1c5   :  { %1551 = vadd.xlane.f32.xlu1 %v1550_v61 }
 0x1c6   :  { %v1455_v43 = vmax.f32 %v1414_v56, 0.0  ;;  %v1417_v1 = vadd.f32 %v1416_v2, %v1281_v52  ;;  %v2149_v32 = vpop.f32.mrb[96].mxu0 }
 0x1c7   :  { %v2150_v59 = vpop.f32.mrb[97].mxu0 }
 0x1c8   :  { %v1456_v6 = vmax.f32 %v1417_v1, 0.0  ;;  %v2151_v58 = vadd.f32 %v2150_v59, %v2149_v32  ;;  %v2152_v4 = vpop.f32.mrb[98].mxu0  ;;  %v1487_v5 = vmul.f32 %v2700_v60, %v1455_v43  ;;  %v1421_v8 = vpop.f32.mrb[96].mxu1 }
 0x1c9   :  { %v2153_v7 = vpop.f32.mrb[99].mxu0  ;;  %v1423_v62 = vpop.f32.mrb[97].mxu1 }
 0x1ca   :  { %v2154_v0 = vadd.f32 %v2153_v7, %v2152_v4  ;;  %v1286_v9 = vadd.f32 %v2151_v58, %v2688_v17  ;;  %v1553_v63 = vsel %vm1492_vm2, %v1487_v5, 0.0  ;;  %v1488_v10 = vmul.f32 %v2700_v60, %v1456_v6  ;;  %v1424_v35 = vpop.f32.mrb[98].mxu1 }
 0x1cb   :  { %1554 = vadd.xlane.f32.xlu0 %v1553_v63  ;;  %v1426_v12 = vpop.f32.mrb[99].mxu1 }
 0x1cc   :  { %v1422_v11 = vadd.f32 %v1421_v8, %v1286_v9  ;;  %v1289_v3 = vadd.f32 %v2154_v0, %v2690_v23  ;;  %v1556_v21 = vsel %vm1492_vm2, %v1488_v10, 0.0 }
 0x1cd   :  { %1557 = vadd.xlane.f32.xlu1 %v1556_v21 }
 0x1ce   :  { %v1457_v13 = vmax.f32 %v1422_v11, 0.0  ;;  %v1425_v15 = vadd.f32 %v1424_v35, %v1289_v3  ;;  %v2155_v20 = vpop.f32.mrb[100].mxu0 }
 0x1cf   :  { %v2156_v22 = vpop.f32.mrb[101].mxu0 }
 0x1d0   :  { %v1458_v25 = vmax.f32 %v1425_v15, 0.0  ;;  %v2157_v17 = vadd.f32 %v2156_v22, %v2155_v20  ;;  %v2158_v14 = vpop.f32.mrb[102].mxu0  ;;  %v1489_v26 = vmul.f32 %v2700_v60, %v1457_v13  ;;  %v1429_v24 = vpop.f32.mrb[100].mxu1 }
 0x1d1   :  { %v2159_v27 = vpop.f32.mrb[103].mxu0  ;;  %v1431_v49 = vpop.f32.mrb[101].mxu1 }
 0x1d2   :  { %v1294_v28 = vadd.f32 %v2157_v17, %v2693_v38  ;;  %v1559_v23 = vsel %vm1492_vm2, %v1489_v26, 0.0  ;;  %v1490_v29 = vmul.f32 %v2700_v60, %v1458_v25  ;;  %v1432_v30 = vpop.f32.mrb[102].mxu1  ;;  %v2778_v38 = vstv %s2909_s4 }
 0x1d3   :  { %1560 = vadd.xlane.f32.xlu0 %v1559_v23  ;;  %v1433_v31 = vpop.f32.mrb[103].mxu1 }
 0x1d4   :  { %v1430_v18 = vadd.f32 %v1429_v24, %v1294_v28  ;;  %v1562_v33 = vsel %vm1492_vm2, %v1490_v29, 0.0 }
 0x1d5   :  { %1563 = vadd.xlane.f32.xlu1 %v1562_v33 }
 0x1d6   :  { %v1459_v16 = vmax.f32 %v1430_v18, 0.0 }
 0x1d8   :  { %v1491_v34 = vmul.f32 %v2700_v60, %v1459_v16 }
 0x1da   :  { %v1565_v37 = vsel %vm1492_vm2, %v1491_v34, 0.0 }
 0x1db   :  { %1566 = vadd.xlane.f32.xlu0 %v1565_v37 }
 0x208   :  { %v1495_v53 = vpop.xlane.xlu0 %1494 }
 0x209   :  { %v1570_v41 = vadd.f32 %v2778_v38, %v1495_v53 }
 0x20b   :  { %v1854_v39 = vmul.f32 -1.442695, %v1570_v41 }
 0x20c   :  { %v1498_v44 = vpop.xlane.xlu0 %1497 }
 0x20d   :  { %2228 = vpow2.f32 %v1854_v39  ;;  %v1571_v45 = vadd.f32 %v2778_v38, %v1498_v44 }
 0x20f   :  { %v1855_v46 = vmul.f32 -1.442695, %v1571_v45 }
 0x210   :  { %v1501_v36 = vpop.xlane.xlu1 %1500 }
 0x211   :  { %2230 = vpow2.f32 %v1855_v46  ;;  %v1572_v60 = vadd.f32 %v2778_v38, %v1501_v36 }
 0x213   :  { %v1856_v47 = vmul.f32 -1.442695, %v1572_v60 }
 0x214   :  { %v1504_v19 = vpop.xlane.xlu1 %1503 }
 0x215   :  { %2232 = vpow2.f32 %v1856_v47  ;;  %v1573_v48 = vadd.f32 %v2778_v38, %v1504_v19 }
 0x217   :  { %v2229_v50 = vpop.eup %2228  ;;  %v1857_v42 = vmul.f32 -1.442695, %v1573_v48 }
 0x218   :  { %v1670_v51 = vadd.f32 1.0, %v2229_v50  ;;  %v1507_v54 = vpop.xlane.xlu0 %1506 }
 0x219   :  { %2234 = vpow2.f32 %v1857_v42  ;;  %v1574_v40 = vadd.f32 %v2778_v38, %v1507_v54 }
 0x21a   :  { %2236 = vrcp.f32 %v1670_v51  ;;  %v1510_v55 = vpop.xlane.xlu1 %1509 }
 0x21b   :  { %v2231_v2 = vpop.eup %2230  ;;  %v1858_v56 = vmul.f32 -1.442695, %v1574_v40  ;;  %v1575_v52 = vadd.f32 %v2778_v38, %v1510_v55 }
 0x21c   :  { %v1671_v57 = vadd.f32 1.0, %v2231_v2 }
 0x21d   :  { %2238 = vpow2.f32 %v1858_v56  ;;  %v1859_v61 = vmul.f32 -1.442695, %v1575_v52 }
 0x21e   :  { %2240 = vrcp.f32 %v1671_v57 }
 0x21f   :  { %v2233_v43 = vpop.eup %2232  ;;  %2242 = vpow2.f32 %v1859_v61 }
 0x220   :  { %v1672_v1 = vadd.f32 1.0, %v2233_v43  ;;  %v1513_v32 = vpop.xlane.xlu0 %1512 }
 0x221   :  { %v1576_v59 = vadd.f32 %v2778_v38, %v1513_v32 }
 0x222   :  { %2244 = vrcp.f32 %v1672_v1  ;;  %v1516_v6 = vpop.xlane.xlu1 %1515 }
 0x223   :  { %v2235_v58 = vpop.eup %2234  ;;  %v1860_v4 = vmul.f32 -1.442695, %v1576_v59  ;;  %v1577_v5 = vadd.f32 %v2778_v38, %v1516_v6 }
 0x224   :  { %v2237_v7 = vpop.eup %2236  ;;  %v1673_v8 = vadd.f32 1.0, %v2235_v58 }
 0x225   :  { %1746 = vst.msk [vmem:[%s2910_s5] sm:$0xff] %vm1745_vm3, %v2237_v7  ;;  %2246 = vpow2.f32 %v1860_v4  ;;  %v1861_v0 = vmul.f32 -1.442695, %v1577_v5 }
 0x226   :  { %2248 = vrcp.f32 %v1673_v8 }
 0x227   :  { %v2239_v9 = vpop.eup %2238  ;;  %2250 = vpow2.f32 %v1861_v0 }
 0x228   :  { %v2241_v62 = vpop.eup %2240  ;;  %v1674_v63 = vadd.f32 1.0, %v2239_v9  ;;  %v1519_v10 = vpop.xlane.xlu0 %1518 }
 0x229   :  { %v2243_v35 = vpop.eup %2242  ;;  %1747 = vst.msk [vmem:[%s2910_s5 + $0x8] sm:$0xff] %vm1745_vm3, %v2241_v62  ;;  %v1578_v11 = vadd.f32 %v2778_v38, %v1519_v10 }
 0x22a   :  { %2252 = vrcp.f32 %v1674_v63  ;;  %v1675_v3 = vadd.f32 1.0, %v2243_v35  ;;  %v1522_v12 = vpop.xlane.xlu1 %1521 }
 0x22b   :  { %v1862_v21 = vmul.f32 -1.442695, %v1578_v11  ;;  %v1579_v13 = vadd.f32 %v2778_v38, %v1522_v12 }
 0x22c   :  { %v2245_v15 = vpop.eup %2244  ;;  %2254 = vrcp.f32 %v1675_v3 }
 0x22d   :  { %1748 = vst.msk [vmem:[%s2910_s5 + $0x10] sm:$0xff] %vm1745_vm3, %v2245_v15  ;;  %2256 = vpow2.f32 %v1862_v21  ;;  %v1863_v20 = vmul.f32 -1.442695, %v1579_v13 }
 0x22f   :  { %v2247_v22 = vpop.eup %2246  ;;  %2258 = vpow2.f32 %v1863_v20 }
 0x230   :  { %v2249_v25 = vpop.eup %2248  ;;  %v1676_v17 = vadd.f32 1.0, %v2247_v22  ;;  %v1525_v14 = vpop.xlane.xlu0 %1524 }
 0x231   :  { %v2251_v26 = vpop.eup %2250  ;;  %1749 = vst.msk [vmem:[%s2910_s5 + $0x18] sm:$0xff] %vm1745_vm3, %v2249_v25  ;;  %v1580_v27 = vadd.f32 %v2778_v38, %v1525_v14 }
 0x232   :  { %2260 = vrcp.f32 %v1676_v17  ;;  %v1677_v24 = vadd.f32 1.0, %v2251_v26  ;;  %v1528_v28 = vpop.xlane.xlu1 %1527 }
 0x233   :  { %v1864_v49 = vmul.f32 -1.442695, %v1580_v27  ;;  %v1581_v23 = vadd.f32 %v2778_v38, %v1528_v28 }
 0x234   :  { %v2253_v29 = vpop.eup %2252  ;;  %2262 = vrcp.f32 %v1677_v24 }
 0x235   :  { %1750 = vst.msk [vmem:[%s2910_s5 + $0x20] sm:$0xff] %vm1745_vm3, %v2253_v29  ;;  %2264 = vpow2.f32 %v1864_v49  ;;  %v1865_v30 = vmul.f32 -1.442695, %v1581_v23 }
 0x236   :  { %v2255_v18 = vpop.eup %2254 }
 0x237   :  { %v2257_v31 = vpop.eup %2256  ;;  %1751 = vst.msk [vmem:[%s2910_s5 + $0x28] sm:$0xff] %vm1745_vm3, %v2255_v18  ;;  %2266 = vpow2.f32 %v1865_v30 }
 0x238   :  { %v1678_v33 = vadd.f32 1.0, %v2257_v31  ;;  %v1531_v16 = vpop.xlane.xlu0 %1530 }
 0x239   :  { %v2259_v34 = vpop.eup %2258  ;;  %v1582_v37 = vadd.f32 %v2778_v38, %v1531_v16 }
 0x23a   :  { %2268 = vrcp.f32 %v1678_v33  ;;  %v1679_v53 = vadd.f32 1.0, %v2259_v34  ;;  %v1534_v41 = vpop.xlane.xlu1 %1533 }
 0x23b   :  { %v1866_v39 = vmul.f32 -1.442695, %v1582_v37  ;;  %v1583_v44 = vadd.f32 %v2778_v38, %v1534_v41 }
 0x23c   :  { %v2261_v45 = vpop.eup %2260  ;;  %2270 = vrcp.f32 %v1679_v53 }
 0x23d   :  { %1752 = vst.msk [vmem:[%s2910_s5 + $0x30] sm:$0xff] %vm1745_vm3, %v2261_v45  ;;  %2272 = vpow2.f32 %v1866_v39  ;;  %v1867_v46 = vmul.f32 -1.442695, %v1583_v44 }
 0x23e   :  { %v2263_v36 = vpop.eup %2262 }
 0x23f   :  { %v2265_v60 = vpop.eup %2264  ;;  %1753 = vst.msk [vmem:[%s2910_s5 + $0x38] sm:$0xff] %vm1745_vm3, %v2263_v36  ;;  %2274 = vpow2.f32 %v1867_v46 }
 0x240   :  { %v1680_v47 = vadd.f32 1.0, %v2265_v60  ;;  %v1537_v19 = vpop.xlane.xlu0 %1536 }
 0x241   :  { %v2267_v48 = vpop.eup %2266  ;;  %v1584_v50 = vadd.f32 %v2778_v38, %v1537_v19 }
 0x242   :  { %2276 = vrcp.f32 %v1680_v47  ;;  %v1681_v42 = vadd.f32 1.0, %v2267_v48  ;;  %v1540_v51 = vpop.xlane.xlu1 %1539 }
 0x243   :  { %v1868_v54 = vmul.f32 -1.442695, %v1584_v50  ;;  %v1585_v40 = vadd.f32 %v2778_v38, %v1540_v51 }
 0x244   :  { %v2269_v55 = vpop.eup %2268  ;;  %2278 = vrcp.f32 %v1681_v42 }
 0x245   :  { %1754 = vst.msk [vmem:[%s2910_s5 + $0x40] sm:$0xff] %vm1745_vm3, %v2269_v55  ;;  %2280 = vpow2.f32 %v1868_v54  ;;  %v1869_v2 = vmul.f32 -1.442695, %v1585_v40 }
 0x246   :  { %v2271_v56 = vpop.eup %2270 }
 0x247   :  { %v2273_v52 = vpop.eup %2272  ;;  %1755 = vst.msk [vmem:[%s2910_s5 + $0x48] sm:$0xff] %vm1745_vm3, %v2271_v56  ;;  %2282 = vpow2.f32 %v1869_v2 }
 0x248   :  { %v1682_v57 = vadd.f32 1.0, %v2273_v52  ;;  %v1543_v61 = vpop.xlane.xlu0 %1542 }
 0x249   :  { %v2275_v43 = vpop.eup %2274  ;;  %v1586_v1 = vadd.f32 %v2778_v38, %v1543_v61 }
 0x24a   :  { %2284 = vrcp.f32 %v1682_v57  ;;  %v1683_v32 = vadd.f32 1.0, %v2275_v43  ;;  %v1546_v59 = vpop.xlane.xlu1 %1545 }
 0x24b   :  { %v1870_v6 = vmul.f32 -1.442695, %v1586_v1  ;;  %v1587_v58 = vadd.f32 %v2778_v38, %v1546_v59 }
 0x24c   :  { %v2277_v4 = vpop.eup %2276  ;;  %2286 = vrcp.f32 %v1683_v32 }
 0x24d   :  { %1756 = vst.msk [vmem:[%s2910_s5 + $0x50] sm:$0xff] %vm1745_vm3, %v2277_v4  ;;  %2288 = vpow2.f32 %v1870_v6  ;;  %v1871_v5 = vmul.f32 -1.442695, %v1587_v58 }
 0x24e   :  { %v2279_v7 = vpop.eup %2278 }
 0x24f   :  { %v2281_v8 = vpop.eup %2280  ;;  %1757 = vst.msk [vmem:[%s2910_s5 + $0x58] sm:$0xff] %vm1745_vm3, %v2279_v7  ;;  %2290 = vpow2.f32 %v1871_v5 }
 0x250   :  { %v1684_v0 = vadd.f32 1.0, %v2281_v8  ;;  %v1549_v9 = vpop.xlane.xlu0 %1548 }
 0x251   :  { %v2283_v62 = vpop.eup %2282  ;;  %v1588_v63 = vadd.f32 %v2778_v38, %v1549_v9 }
 0x252   :  { %2292 = vrcp.f32 %v1684_v0  ;;  %v1685_v10 = vadd.f32 1.0, %v2283_v62  ;;  %v1552_v35 = vpop.xlane.xlu1 %1551 }
 0x253   :  { %v1872_v11 = vmul.f32 -1.442695, %v1588_v63  ;;  %v1589_v3 = vadd.f32 %v2778_v38, %v1552_v35 }
 0x254   :  { %v2285_v12 = vpop.eup %2284  ;;  %2294 = vrcp.f32 %v1685_v10 }
 0x255   :  { %1758 = vst.msk [vmem:[%s2910_s5 + $0x60] sm:$0xff] %vm1745_vm3, %v2285_v12  ;;  %2296 = vpow2.f32 %v1872_v11  ;;  %v1873_v21 = vmul.f32 -1.442695, %v1589_v3 }
 0x256   :  { %v2287_v13 = vpop.eup %2286 }
 0x257   :  { %v2289_v15 = vpop.eup %2288  ;;  %1759 = vst.msk [vmem:[%s2910_s5 + $0x68] sm:$0xff] %vm1745_vm3, %v2287_v13  ;;  %2298 = vpow2.f32 %v1873_v21 }
 0x258   :  { %v1686_v20 = vadd.f32 1.0, %v2289_v15  ;;  %v1555_v22 = vpop.xlane.xlu0 %1554 }
 0x259   :  { %v2291_v25 = vpop.eup %2290  ;;  %v1590_v17 = vadd.f32 %v2778_v38, %v1555_v22 }
 0x25a   :  { %2300 = vrcp.f32 %v1686_v20  ;;  %v1687_v14 = vadd.f32 1.0, %v2291_v25  ;;  %v1558_v26 = vpop.xlane.xlu1 %1557 }
 0x25b   :  { %v1874_v27 = vmul.f32 -1.442695, %v1590_v17  ;;  %v1591_v24 = vadd.f32 %v2778_v38, %v1558_v26 }
 0x25c   :  { %v2293_v28 = vpop.eup %2292  ;;  %2302 = vrcp.f32 %v1687_v14 }
 0x25d   :  { %1760 = vst.msk [vmem:[%s2910_s5 + $0x70] sm:$0xff] %vm1745_vm3, %v2293_v28  ;;  %2304 = vpow2.f32 %v1874_v27  ;;  %v1875_v49 = vmul.f32 -1.442695, %v1591_v24 }
 0x25e   :  { %v2295_v23 = vpop.eup %2294 }
 0x25f   :  { %v2297_v29 = vpop.eup %2296  ;;  %1761 = vst.msk [vmem:[%s2910_s5 + $0x78] sm:$0xff] %vm1745_vm3, %v2295_v23  ;;  %2306 = vpow2.f32 %v1875_v49 }
 0x260   :  { %v1688_v30 = vadd.f32 1.0, %v2297_v29  ;;  %v1561_v18 = vpop.xlane.xlu0 %1560 }
 0x261   :  { %v2299_v31 = vpop.eup %2298  ;;  %v1592_v33 = vadd.f32 %v2778_v38, %v1561_v18 }
 0x262   :  { %2308 = vrcp.f32 %v1688_v30  ;;  %v1689_v16 = vadd.f32 1.0, %v2299_v31  ;;  %v1564_v34 = vpop.xlane.xlu1 %1563 }
 0x263   :  { %v1876_v37 = vmul.f32 -1.442695, %v1592_v33  ;;  %v1593_v53 = vadd.f32 %v2778_v38, %v1564_v34 }
 0x264   :  { %v2301_v41 = vpop.eup %2300  ;;  %2310 = vrcp.f32 %v1689_v16 }
 0x265   :  { %1762 = vst.msk [vmem:[%s2910_s5 + $0x80] sm:$0xff] %vm1745_vm3, %v2301_v41  ;;  %2312 = vpow2.f32 %v1876_v37  ;;  %v1877_v39 = vmul.f32 -1.442695, %v1593_v53 }
 0x266   :  { %v2303_v44 = vpop.eup %2302 }
 0x267   :  { %v2305_v45 = vpop.eup %2304  ;;  %1763 = vst.msk [vmem:[%s2910_s5 + $0x88] sm:$0xff] %vm1745_vm3, %v2303_v44  ;;  %2314 = vpow2.f32 %v1877_v39 }
 0x268   :  { %v1690_v46 = vadd.f32 1.0, %v2305_v45  ;;  %v1567_v36 = vpop.xlane.xlu0 %1566 }
 0x269   :  { %v2307_v60 = vpop.eup %2306  ;;  %v1594_v47 = vadd.f32 %v2778_v38, %v1567_v36 }
 0x26a   :  { %2316 = vrcp.f32 %v1690_v46  ;;  %v1691_v19 = vadd.f32 1.0, %v2307_v60 }
 0x26b   :  { %v1878_v48 = vmul.f32 -1.442695, %v1594_v47 }
 0x26c   :  { %v2309_v50 = vpop.eup %2308  ;;  %2318 = vrcp.f32 %v1691_v19 }
 0x26d   :  { %1764 = vst.msk [vmem:[%s2910_s5 + $0x90] sm:$0xff] %vm1745_vm3, %v2309_v50  ;;  %2320 = vpow2.f32 %v1878_v48 }
 0x26e   :  { %v2311_v42 = vpop.eup %2310 }
 0x26f   :  { %v2313_v51 = vpop.eup %2312  ;;  %1765 = vst.msk [vmem:[%s2910_s5 + $0x98] sm:$0xff] %vm1745_vm3, %v2311_v42 }
 0x270   :  { %v1692_v54 = vadd.f32 1.0, %v2313_v51 }
 0x271   :  { %v2315_v38 = vpop.eup %2314 }
 0x272   :  { %2322 = vrcp.f32 %v1692_v54  ;;  %v1693_v40 = vadd.f32 1.0, %v2315_v38 }
 0x274   :  { %v2317_v55 = vpop.eup %2316  ;;  %2324 = vrcp.f32 %v1693_v40 }
 0x275   :  { %1766 = vst.msk [vmem:[%s2910_s5 + $0xa0] sm:$0xff] %vm1745_vm3, %v2317_v55 }
 0x276   :  { %v2319_v2 = vpop.eup %2318 }
 0x277   :  { %v2321_v56 = vpop.eup %2320  ;;  %1767 = vst.msk [vmem:[%s2910_s5 + $0xa8] sm:$0xff] %vm1745_vm3, %v2319_v2 }
 0x278   :  { %v1694_v52 = vadd.f32 1.0, %v2321_v56 }
 0x27a   :  { %2326 = vrcp.f32 %v1694_v52 }
 0x27c   :  { %v2323_v57 = vpop.eup %2322 }
 0x27d   :  { %1768 = vst.msk [vmem:[%s2910_s5 + $0xb0] sm:$0xff] %vm1745_vm3, %v2323_v57 }
 0x27e   :  { %v2325_v61 = vpop.eup %2324 }
 0x27f   :  { %1769 = vst.msk [vmem:[%s2910_s5 + $0xb8] sm:$0xff] %vm1745_vm3, %v2325_v61 }
 0x284   :  { %v2327_v43 = vpop.eup %2326 }
 0x285   :  { %1770 = vst.msk [vmem:[%s2910_s5 + $0xc0] sm:$0xff] %vm1745_vm3, %v2327_v43 }
 0x286   :  { %1775 = vsyncpa [#allocation4], 1 }

</bundles_post_ra>
